<compile_context>
chip_gen: v7x
topology: tpu7x:2x2x1
jax: 0.10.0
libtpu: 0.0.40
codegen_flags: <defaults>
</compile_context>

<pallas_src>
import functools

import jax
import jax.numpy as jnp
from jax import lax
from jax.experimental import pallas as pl
from jax.experimental.pallas import tpu as pltpu

N_PER_LAYER = 5  # G2 (fused gate weight), bias row, vec(W_0), E, S


def egcu_h_kernel(*refs, dims):
    num_layers = len(dims)
    a_ref, x_ref = refs[0], refs[1]
    layer_refs = refs[2:2 + N_PER_LAYER * num_layers]
    out_ref = refs[2 + N_PER_LAYER * num_layers]

    T = a_ref.shape[0]

    # Carry: per-layer vec(W) (flat GRU hidden) + the last-layer embeddings.
    w_init = tuple(layer_refs[l * N_PER_LAYER + 2][...]
                   for l in range(num_layers))
    carry0 = w_init + (jnp.zeros(out_ref.shape, jnp.float32),)

    def time_step(t, carry):
        ws = carry[:num_layers]
        A = a_ref[t]                                   # (N, N)
        H = x_ref[t]                                   # (N, input_dim)
        new_ws = []
        for l in range(num_layers):
            in_d, out_d = dims[l]
            hsz = in_d * out_d
            g_ref, b_ref, _, e_ref, s_ref = layer_refs[
                l * N_PER_LAYER:(l + 1) * N_PER_LAYER]

            # --- WeightUpdateGRU: single fused 4*hsz-wide gate matmul -----
            h_prev = ws[l]                                        # (1, hsz)
            x_mean = jnp.mean(H, axis=0, keepdims=True)           # (1, in_d)
            # h_prev first: lane-aligned (hsz % 128 == 0), no cross-lane shift.
            xh = jnp.concatenate([h_prev, x_mean], axis=-1)       # (1, hsz+in_d)
            gates = jnp.dot(xh, g_ref[...],
                            preferred_element_type=jnp.float32) + b_ref[...]
            s_r = gates[:, 0 * hsz:1 * hsz]   # W_ir x + W_hr h + b_ir + b_hr
            s_z = gates[:, 1 * hsz:2 * hsz]   # W_iz x + W_hz h + b_iz + b_hz
            a_n = gates[:, 2 * hsz:3 * hsz]   # W_in x + b_in
            b_n = gates[:, 3 * hsz:4 * hsz]   # W_hn h + b_hn
            r = jax.nn.sigmoid(s_r)
            z = jax.nn.sigmoid(s_z)
            n = jnp.tanh(a_n + r * b_n)
            h_new = (1.0 - z) * n + z * h_prev                    # (1, hsz)
            new_ws.append(h_new)

            # --- vec(W) -> (in_d, out_d): tiny N-independent matmul -------
            W_mat = jnp.dot(e_ref[...] * h_new, s_ref[...],
                            preferred_element_type=jnp.float32)   # (in_d, out_d)

            # --- GCNLayer: A @ (H @ W) ------------------------------------
            HW = jnp.dot(H, W_mat, preferred_element_type=jnp.float32)
            H = jnp.dot(A, HW, preferred_element_type=jnp.float32)
            if l != num_layers - 1:
                H = jnp.maximum(H, 0.0)                           # ReLU
        return tuple(new_ws) + (H,)

    final = lax.fori_loop(0, T, time_step, carry0, unroll=True)
    out_ref[...] = final[-1].astype(out_ref.dtype)


def egcu_h_forward(A_log, X, layer_params):
    T, num_v, _ = A_log.shape
    dims = tuple((p["w0"].shape[0], p["w0"].shape[1]) for p in layer_params)
    out_dim = dims[-1][1]

    flat_inputs = [A_log.astype(jnp.float32), X.astype(jnp.float32)]
    for p in layer_params:
        in_d, out_d = p["w0"].shape
        hsz = in_d * out_d
        wihT = jnp.transpose(p["wih"]).astype(jnp.float32)      # (in_d, 3*hsz)
        whhT = jnp.transpose(p["whh"]).astype(jnp.float32)      # (hsz, 3*hsz)
        bih = p["bih"].astype(jnp.float32)
        bhh = p["bhh"].astype(jnp.float32)
        # Fused gate weight, rows = [h_prev ; x_mean], cols = [r | z | a_n | b_n]:
        #   [h|x] @ G2 = [W_hr h + W_ir x, W_hz h + W_iz x, W_in x, W_hn h]
        G2 = jnp.zeros((hsz + in_d, 4 * hsz), jnp.float32)
        G2 = G2.at[:hsz, 0 * hsz:1 * hsz].set(whhT[:, 0 * hsz:1 * hsz])
        G2 = G2.at[:hsz, 1 * hsz:2 * hsz].set(whhT[:, 1 * hsz:2 * hsz])
        G2 = G2.at[:hsz, 3 * hsz:4 * hsz].set(whhT[:, 2 * hsz:3 * hsz])
        G2 = G2.at[hsz:, 0 * hsz:1 * hsz].set(wihT[:, 0 * hsz:1 * hsz])
        G2 = G2.at[hsz:, 1 * hsz:2 * hsz].set(wihT[:, 1 * hsz:2 * hsz])
        G2 = G2.at[hsz:, 2 * hsz:3 * hsz].set(wihT[:, 2 * hsz:3 * hsz])
        b2 = jnp.concatenate([
            bih[0 * hsz:1 * hsz] + bhh[0 * hsz:1 * hsz],   # r bias
            bih[1 * hsz:2 * hsz] + bhh[1 * hsz:2 * hsz],   # z bias
            bih[2 * hsz:3 * hsz],                          # b_in
            bhh[2 * hsz:3 * hsz],                          # b_hn
        ]).reshape(1, 4 * hsz)
        # 0/1 expansion matrices: (E * vec(W)) @ S == reshape(vec(W),(in,out)).
        k = jnp.arange(hsz)
        E = (k[None, :] // out_d == jnp.arange(in_d)[:, None]).astype(jnp.float32)
        S = (k[:, None] % out_d == jnp.arange(out_d)[None, :]).astype(jnp.float32)
        flat_inputs += [G2, b2,
                        p["w0"].reshape(1, hsz).astype(jnp.float32), E, S]

    # No grid: every array lives whole in VMEM for the single invocation; the
    # time loop runs inside the kernel (no per-step pipeline overhead).
    in_specs = [pl.BlockSpec(memory_space=pltpu.MemorySpace.VMEM)
                for _ in flat_inputs]
    return pl.pallas_call(
        functools.partial(egcu_h_kernel, dims=dims),
        out_shape=jax.ShapeDtypeStruct((num_v, out_dim), jnp.float32),
        in_specs=in_specs,
        out_specs=pl.BlockSpec(memory_space=pltpu.MemorySpace.VMEM),
    )(*flat_inputs)


def egcu_h_reference(A_log, X, layer_params):
    """Pure-JAX reference matching the PyTorch forward."""
    W = [p["w0"] for p in layer_params]
    L = len(layer_params)
    H_t = None
    for t in range(X.shape[0]):
        A_t = A_log[t]
        H_t = X[t]
        newW = []
        for l, p in enumerate(layer_params):
            x = jnp.mean(H_t, axis=0)
            h = W[l].reshape(-1)
            hsz = h.shape[0]
            gx = p["wih"] @ x + p["bih"]
            gh = p["whh"] @ h + p["bhh"]
            r = jax.nn.sigmoid(gx[:hsz] + gh[:hsz])
            z = jax.nn.sigmoid(gx[hsz:2 * hsz] + gh[hsz:2 * hsz])
            n = jnp.tanh(gx[2 * hsz:] + r * gh[2 * hsz:])
            hn = (1.0 - z) * n + z * h
            Wn = hn.reshape(W[l].shape)
            newW.append(Wn)
            H_t = A_t @ (H_t @ Wn)
            if l != L - 1:
                H_t = jnp.maximum(H_t, 0.0)
        W = newW
    return H_t


def make_params(key, dim_list):
    params = []
    for in_dim, out_dim in dim_list:
        key, k0, k1, k2, k3, k4 = jax.random.split(key, 6)
        hsz = in_dim * out_dim
        bound = 1.0 / (hsz ** 0.5)
        limit = (6.0 / (in_dim + out_dim)) ** 0.5      # xavier_uniform for W_0
        params.append(dict(
            w0=jax.random.uniform(k0, (in_dim, out_dim), jnp.float32, -limit, limit),
            wih=jax.random.uniform(k1, (3 * hsz, in_dim), jnp.float32, -bound, bound),
            whh=jax.random.uniform(k2, (3 * hsz, hsz), jnp.float32, -bound, bound),
            bih=jax.random.uniform(k3, (3 * hsz,), jnp.float32, -bound, bound),
            bhh=jax.random.uniform(k4, (3 * hsz,), jnp.float32, -bound, bound),
        ))
    return params


if __name__ == "__main__":
    # EGCU_H(input_dim=8, hidden_dim=16, output_dim=8, num_gcn_layers=2,
    # attention=False); T=4 time steps, N=16 vertices.
    input_dim, hidden_dim, output_dim, num_gcn_layers = 8, 16, 8, 2
    T, N = 4, 16
    dim_list = list(zip([input_dim] + [hidden_dim] * (num_gcn_layers - 1),
                        [hidden_dim] * (num_gcn_layers - 1) + [output_dim]))

    key = jax.random.PRNGKey(0)
    kp, ka, kx = jax.random.split(key, 3)
    params = make_params(kp, dim_list)

    A_raw = jax.random.uniform(ka, (T, N, N), jnp.float32)
    A_log = A_raw / jnp.sum(A_raw, axis=-1, keepdims=True)   # row-normalized adjacency
    X = jax.random.normal(kx, (T, N, input_dim), jnp.float32)

    out = egcu_h_forward(A_log, X, params)
    out = jax.block_until_ready(out)

    ref = egcu_h_reference(A_log, X, params)
    assert out.shape == (N, output_dim)
    assert jnp.allclose(out, ref, atol=2e-3, rtol=2e-3), float(
        jnp.max(jnp.abs(out - ref)))
    print("KERNEL_OK")
</pallas_src>

<mosaic_0001>
module attributes {stable_mosaic.version = 11 : i64} {
  func.func @egcu_h_kernel(%arg0: memref<4x16x16xf32, #tpu.memory_space<vmem>>, %arg1: memref<4x16x8xf32, #tpu.memory_space<vmem>>, %arg2: memref<136x512xf32, #tpu.memory_space<vmem>>, %arg3: memref<1x512xf32, #tpu.memory_space<vmem>>, %arg4: memref<1x128xf32, #tpu.memory_space<vmem>>, %arg5: memref<8x128xf32, #tpu.memory_space<vmem>>, %arg6: memref<128x16xf32, #tpu.memory_space<vmem>>, %arg7: memref<144x512xf32, #tpu.memory_space<vmem>>, %arg8: memref<1x512xf32, #tpu.memory_space<vmem>>, %arg9: memref<1x128xf32, #tpu.memory_space<vmem>>, %arg10: memref<16x128xf32, #tpu.memory_space<vmem>>, %arg11: memref<128x8xf32, #tpu.memory_space<vmem>>, %arg12: memref<16x8xf32, #tpu.memory_space<vmem>>) attributes {dimension_semantics = [], scalar_prefetch = 0 : i64, scratch_operands = 0 : i64, tpu.core_type = #tpu.core_type<tc>} {
    %c0 = arith.constant 0 : index
    %c0_0 = arith.constant 0 : index
    %0 = vector.load %arg4[%c0, %c0_0] : memref<1x128xf32, #tpu.memory_space<vmem>>, vector<1x128xf32>
    %c0_1 = arith.constant 0 : index
    %c0_2 = arith.constant 0 : index
    %1 = vector.load %arg9[%c0_1, %c0_2] : memref<1x128xf32, #tpu.memory_space<vmem>>, vector<1x128xf32>
    %cst = arith.constant 0.000000e+00 : f32
    %2 = vector.broadcast %cst : f32 to vector<16x8xf32>
    %c0_i32 = arith.constant 0 : i32
    %3 = arith.index_cast %c0_i32 : i32 to index
    %c0_3 = arith.constant 0 : index
    %c0_4 = arith.constant 0 : index
    %4 = vector.load %arg0[%3, %c0_3, %c0_4] : memref<4x16x16xf32, #tpu.memory_space<vmem>>, vector<1x16x16xf32>
    %5 = vector.shape_cast %4 : vector<1x16x16xf32> to vector<16x16xf32>
    %6 = arith.index_cast %c0_i32 : i32 to index
    %c0_5 = arith.constant 0 : index
    %c0_6 = arith.constant 0 : index
    %7 = vector.load %arg1[%6, %c0_5, %c0_6] : memref<4x16x8xf32, #tpu.memory_space<vmem>>, vector<1x16x8xf32>
    %8 = vector.shape_cast %7 : vector<1x16x8xf32> to vector<16x8xf32>
    %cst_7 = arith.constant dense<0.000000e+00> : vector<8xf32>
    %9 = vector.multi_reduction <add>, %8, %cst_7 [0] : vector<16x8xf32> to vector<8xf32>
    %10 = vector.shape_cast %9 : vector<8xf32> to vector<1x8xf32>
    %cst_8 = arith.constant 1.600000e+01 : f32
    %11 = vector.broadcast %cst_8 : f32 to vector<1x8xf32>
    %12 = arith.divf %10, %11 : vector<1x8xf32>
    %13 = tpu.concatenate %0, %12 in 1 : vector<1x128xf32>, vector<1x8xf32> -> vector<1x136xf32>
    %c0_9 = arith.constant 0 : index
    %c0_10 = arith.constant 0 : index
    %14 = vector.load %arg2[%c0_9, %c0_10] : memref<136x512xf32, #tpu.memory_space<vmem>>, vector<136x512xf32>
    %cst_11 = arith.constant dense<0.000000e+00> : vector<1x512xf32>
    %15 = tpu.matmul %13, %14, %cst_11 {dimension_numbers = #tpu.dot_dimension_numbers<[1], [0], [0], [1], [0, 0, 1, 1], [], []>} : vector<1x136xf32>, vector<136x512xf32>, vector<1x512xf32> -> vector<1x512xf32>
    %c0_12 = arith.constant 0 : index
    %c0_13 = arith.constant 0 : index
    %16 = vector.load %arg3[%c0_12, %c0_13] : memref<1x512xf32, #tpu.memory_space<vmem>>, vector<1x512xf32>
    %17 = arith.addf %15, %16 : vector<1x512xf32>
    %18 = vector.extract_strided_slice %17 {offsets = [0, 0], sizes = [1, 128], strides = [1, 1]} : vector<1x512xf32> to vector<1x128xf32>
    %19 = vector.extract_strided_slice %17 {offsets = [0, 128], sizes = [1, 128], strides = [1, 1]} : vector<1x512xf32> to vector<1x128xf32>
    %20 = vector.extract_strided_slice %17 {offsets = [0, 256], sizes = [1, 128], strides = [1, 1]} : vector<1x512xf32> to vector<1x128xf32>
    %21 = vector.extract_strided_slice %17 {offsets = [0, 384], sizes = [1, 128], strides = [1, 1]} : vector<1x512xf32> to vector<1x128xf32>
    %22 = arith.negf %18 : vector<1x128xf32>
    %23 = math.exp %22 : vector<1x128xf32>
    %cst_14 = arith.constant 1.000000e+00 : f32
    %24 = vector.broadcast %cst_14 : f32 to vector<1x128xf32>
    %25 = arith.addf %24, %23 : vector<1x128xf32>
    %26 = arith.divf %24, %25 : vector<1x128xf32>
    %27 = arith.negf %19 : vector<1x128xf32>
    %28 = math.exp %27 : vector<1x128xf32>
    %cst_15 = arith.constant 1.000000e+00 : f32
    %29 = vector.broadcast %cst_15 : f32 to vector<1x128xf32>
    %30 = arith.addf %29, %28 : vector<1x128xf32>
    %31 = arith.divf %29, %30 : vector<1x128xf32>
    %32 = arith.mulf %26, %21 : vector<1x128xf32>
    %33 = arith.addf %20, %32 : vector<1x128xf32>
    %34 = math.tanh %33 : vector<1x128xf32>
    %cst_16 = arith.constant 1.000000e+00 : f32
    %35 = vector.broadcast %cst_16 : f32 to vector<1x128xf32>
    %36 = arith.subf %35, %31 : vector<1x128xf32>
    %37 = arith.mulf %36, %34 : vector<1x128xf32>
    %38 = arith.mulf %31, %0 : vector<1x128xf32>
    %39 = arith.addf %37, %38 : vector<1x128xf32>
    %c0_17 = arith.constant 0 : index
    %c0_18 = arith.constant 0 : index
    %40 = vector.load %arg5[%c0_17, %c0_18] : memref<8x128xf32, #tpu.memory_space<vmem>>, vector<8x128xf32>
    %41 = vector.broadcast %39 : vector<1x128xf32> to vector<8x128xf32>
    %42 = arith.mulf %40, %41 : vector<8x128xf32>
    %c0_19 = arith.constant 0 : index
    %c0_20 = arith.constant 0 : index
    %43 = vector.load %arg6[%c0_19, %c0_20] : memref<128x16xf32, #tpu.memory_space<vmem>>, vector<128x16xf32>
    %cst_21 = arith.constant dense<0.000000e+00> : vector<8x16xf32>
    %44 = tpu.matmul %42, %43, %cst_21 {dimension_numbers = #tpu.dot_dimension_numbers<[1], [0], [0], [1], [0, 0, 1, 1], [], []>} : vector<8x128xf32>, vector<128x16xf32>, vector<8x16xf32> -> vector<8x16xf32>
    %cst_22 = arith.constant dense<0.000000e+00> : vector<16x16xf32>
    %45 = tpu.matmul %8, %44, %cst_22 {dimension_numbers = #tpu.dot_dimension_numbers<[1], [0], [0], [1], [0, 0, 1, 1], [], []>} : vector<16x8xf32>, vector<8x16xf32>, vector<16x16xf32> -> vector<16x16xf32>
    %cst_23 = arith.constant dense<0.000000e+00> : vector<16x16xf32>
    %46 = tpu.matmul %5, %45, %cst_23 {dimension_numbers = #tpu.dot_dimension_numbers<[1], [0], [0], [1], [0, 0, 1, 1], [], []>} : vector<16x16xf32>, vector<16x16xf32>, vector<16x16xf32> -> vector<16x16xf32>
    %cst_24 = arith.constant 0.000000e+00 : f32
    %47 = vector.broadcast %cst_24 : f32 to vector<16x16xf32>
    %48 = arith.maximumf %46, %47 : vector<16x16xf32>
    %cst_25 = arith.constant dense<0.000000e+00> : vector<16xf32>
    %49 = vector.multi_reduction <add>, %48, %cst_25 [0] : vector<16x16xf32> to vector<16xf32>
    %50 = vector.shape_cast %49 : vector<16xf32> to vector<1x16xf32>
    %cst_26 = arith.constant 1.600000e+01 : f32
    %51 = vector.broadcast %cst_26 : f32 to vector<1x16xf32>
    %52 = arith.divf %50, %51 : vector<1x16xf32>
    %53 = tpu.concatenate %1, %52 in 1 : vector<1x128xf32>, vector<1x16xf32> -> vector<1x144xf32>
    %c0_27 = arith.constant 0 : index
    %c0_28 = arith.constant 0 : index
    %54 = vector.load %arg7[%c0_27, %c0_28] : memref<144x512xf32, #tpu.memory_space<vmem>>, vector<144x512xf32>
    %cst_29 = arith.constant dense<0.000000e+00> : vector<1x512xf32>
    %55 = tpu.matmul %53, %54, %cst_29 {dimension_numbers = #tpu.dot_dimension_numbers<[1], [0], [0], [1], [0, 0, 1, 1], [], []>} : vector<1x144xf32>, vector<144x512xf32>, vector<1x512xf32> -> vector<1x512xf32>
    %c0_30 = arith.constant 0 : index
    %c0_31 = arith.constant 0 : index
    %56 = vector.load %arg8[%c0_30, %c0_31] : memref<1x512xf32, #tpu.memory_space<vmem>>, vector<1x512xf32>
    %57 = arith.addf %55, %56 : vector<1x512xf32>
    %58 = vector.extract_strided_slice %57 {offsets = [0, 0], sizes = [1, 128], strides = [1, 1]} : vector<1x512xf32> to vector<1x128xf32>
    %59 = vector.extract_strided_slice %57 {offsets = [0, 128], sizes = [1, 128], strides = [1, 1]} : vector<1x512xf32> to vector<1x128xf32>
    %60 = vector.extract_strided_slice %57 {offsets = [0, 256], sizes = [1, 128], strides = [1, 1]} : vector<1x512xf32> to vector<1x128xf32>
    %61 = vector.extract_strided_slice %57 {offsets = [0, 384], sizes = [1, 128], strides = [1, 1]} : vector<1x512xf32> to vector<1x128xf32>
    %62 = arith.negf %58 : vector<1x128xf32>
    %63 = math.exp %62 : vector<1x128xf32>
    %cst_32 = arith.constant 1.000000e+00 : f32
    %64 = vector.broadcast %cst_32 : f32 to vector<1x128xf32>
    %65 = arith.addf %64, %63 : vector<1x128xf32>
    %66 = arith.divf %64, %65 : vector<1x128xf32>
    %67 = arith.negf %59 : vector<1x128xf32>
    %68 = math.exp %67 : vector<1x128xf32>
    %cst_33 = arith.constant 1.000000e+00 : f32
    %69 = vector.broadcast %cst_33 : f32 to vector<1x128xf32>
    %70 = arith.addf %69, %68 : vector<1x128xf32>
    %71 = arith.divf %69, %70 : vector<1x128xf32>
    %72 = arith.mulf %66, %61 : vector<1x128xf32>
    %73 = arith.addf %60, %72 : vector<1x128xf32>
    %74 = math.tanh %73 : vector<1x128xf32>
    %cst_34 = arith.constant 1.000000e+00 : f32
    %75 = vector.broadcast %cst_34 : f32 to vector<1x128xf32>
    %76 = arith.subf %75, %71 : vector<1x128xf32>
    %77 = arith.mulf %76, %74 : vector<1x128xf32>
    %78 = arith.mulf %71, %1 : vector<1x128xf32>
    %79 = arith.addf %77, %78 : vector<1x128xf32>
    %c0_35 = arith.constant 0 : index
    %c0_36 = arith.constant 0 : index
    %80 = vector.load %arg10[%c0_35, %c0_36] : memref<16x128xf32, #tpu.memory_space<vmem>>, vector<16x128xf32>
    %81 = vector.broadcast %79 : vector<1x128xf32> to vector<16x128xf32>
    %82 = arith.mulf %80, %81 : vector<16x128xf32>
    %c0_37 = arith.constant 0 : index
    %c0_38 = arith.constant 0 : index
    %83 = vector.load %arg11[%c0_37, %c0_38] : memref<128x8xf32, #tpu.memory_space<vmem>>, vector<128x8xf32>
    %cst_39 = arith.constant dense<0.000000e+00> : vector<16x8xf32>
    %84 = tpu.matmul %82, %83, %cst_39 {dimension_numbers = #tpu.dot_dimension_numbers<[1], [0], [0], [1], [0, 0, 1, 1], [], []>} : vector<16x128xf32>, vector<128x8xf32>, vector<16x8xf32> -> vector<16x8xf32>
    %cst_40 = arith.constant dense<0.000000e+00> : vector<16x8xf32>
    %85 = tpu.matmul %48, %84, %cst_40 {dimension_numbers = #tpu.dot_dimension_numbers<[1], [0], [0], [1], [0, 0, 1, 1], [], []>} : vector<16x16xf32>, vector<16x8xf32>, vector<16x8xf32> -> vector<16x8xf32>
    %cst_41 = arith.constant dense<0.000000e+00> : vector<16x8xf32>
    %86 = tpu.matmul %5, %85, %cst_41 {dimension_numbers = #tpu.dot_dimension_numbers<[1], [0], [0], [1], [0, 0, 1, 1], [], []>} : vector<16x16xf32>, vector<16x8xf32>, vector<16x8xf32> -> vector<16x8xf32>
    %c1_i32 = arith.constant 1 : i32
    %87 = arith.index_cast %c1_i32 : i32 to index
    %c0_42 = arith.constant 0 : index
    %c0_43 = arith.constant 0 : index
    %88 = vector.load %arg0[%87, %c0_42, %c0_43] : memref<4x16x16xf32, #tpu.memory_space<vmem>>, vector<1x16x16xf32>
    %89 = vector.shape_cast %88 : vector<1x16x16xf32> to vector<16x16xf32>
    %90 = arith.index_cast %c1_i32 : i32 to index
    %c0_44 = arith.constant 0 : index
    %c0_45 = arith.constant 0 : index
    %91 = vector.load %arg1[%90, %c0_44, %c0_45] : memref<4x16x8xf32, #tpu.memory_space<vmem>>, vector<1x16x8xf32>
    %92 = vector.shape_cast %91 : vector<1x16x8xf32> to vector<16x8xf32>
    %cst_46 = arith.constant dense<0.000000e+00> : vector<8xf32>
    %93 = vector.multi_reduction <add>, %92, %cst_46 [0] : vector<16x8xf32> to vector<8xf32>
    %94 = vector.shape_cast %93 : vector<8xf32> to vector<1x8xf32>
    %cst_47 = arith.constant 1.600000e+01 : f32
    %95 = vector.broadcast %cst_47 : f32 to vector<1x8xf32>
    %96 = arith.divf %94, %95 : vector<1x8xf32>
    %97 = tpu.concatenate %39, %96 in 1 : vector<1x128xf32>, vector<1x8xf32> -> vector<1x136xf32>
    %c0_48 = arith.constant 0 : index
    %c0_49 = arith.constant 0 : index
    %98 = vector.load %arg2[%c0_48, %c0_49] : memref<136x512xf32, #tpu.memory_space<vmem>>, vector<136x512xf32>
    %cst_50 = arith.constant dense<0.000000e+00> : vector<1x512xf32>
    %99 = tpu.matmul %97, %98, %cst_50 {dimension_numbers = #tpu.dot_dimension_numbers<[1], [0], [0], [1], [0, 0, 1, 1], [], []>} : vector<1x136xf32>, vector<136x512xf32>, vector<1x512xf32> -> vector<1x512xf32>
    %c0_51 = arith.constant 0 : index
    %c0_52 = arith.constant 0 : index
    %100 = vector.load %arg3[%c0_51, %c0_52] : memref<1x512xf32, #tpu.memory_space<vmem>>, vector<1x512xf32>
    %101 = arith.addf %99, %100 : vector<1x512xf32>
    %102 = vector.extract_strided_slice %101 {offsets = [0, 0], sizes = [1, 128], strides = [1, 1]} : vector<1x512xf32> to vector<1x128xf32>
    %103 = vector.extract_strided_slice %101 {offsets = [0, 128], sizes = [1, 128], strides = [1, 1]} : vector<1x512xf32> to vector<1x128xf32>
    %104 = vector.extract_strided_slice %101 {offsets = [0, 256], sizes = [1, 128], strides = [1, 1]} : vector<1x512xf32> to vector<1x128xf32>
    %105 = vector.extract_strided_slice %101 {offsets = [0, 384], sizes = [1, 128], strides = [1, 1]} : vector<1x512xf32> to vector<1x128xf32>
    %106 = arith.negf %102 : vector<1x128xf32>
    %107 = math.exp %106 : vector<1x128xf32>
    %cst_53 = arith.constant 1.000000e+00 : f32
    %108 = vector.broadcast %cst_53 : f32 to vector<1x128xf32>
    %109 = arith.addf %108, %107 : vector<1x128xf32>
    %110 = arith.divf %108, %109 : vector<1x128xf32>
    %111 = arith.negf %103 : vector<1x128xf32>
    %112 = math.exp %111 : vector<1x128xf32>
    %cst_54 = arith.constant 1.000000e+00 : f32
    %113 = vector.broadcast %cst_54 : f32 to vector<1x128xf32>
    %114 = arith.addf %113, %112 : vector<1x128xf32>
    %115 = arith.divf %113, %114 : vector<1x128xf32>
    %116 = arith.mulf %110, %105 : vector<1x128xf32>
    %117 = arith.addf %104, %116 : vector<1x128xf32>
    %118 = math.tanh %117 : vector<1x128xf32>
    %cst_55 = arith.constant 1.000000e+00 : f32
    %119 = vector.broadcast %cst_55 : f32 to vector<1x128xf32>
    %120 = arith.subf %119, %115 : vector<1x128xf32>
    %121 = arith.mulf %120, %118 : vector<1x128xf32>
    %122 = arith.mulf %115, %39 : vector<1x128xf32>
    %123 = arith.addf %121, %122 : vector<1x128xf32>
    %c0_56 = arith.constant 0 : index
    %c0_57 = arith.constant 0 : index
    %124 = vector.load %arg5[%c0_56, %c0_57] : memref<8x128xf32, #tpu.memory_space<vmem>>, vector<8x128xf32>
    %125 = vector.broadcast %123 : vector<1x128xf32> to vector<8x128xf32>
    %126 = arith.mulf %124, %125 : vector<8x128xf32>
    %c0_58 = arith.constant 0 : index
    %c0_59 = arith.constant 0 : index
    %127 = vector.load %arg6[%c0_58, %c0_59] : memref<128x16xf32, #tpu.memory_space<vmem>>, vector<128x16xf32>
    %cst_60 = arith.constant dense<0.000000e+00> : vector<8x16xf32>
    %128 = tpu.matmul %126, %127, %cst_60 {dimension_numbers = #tpu.dot_dimension_numbers<[1], [0], [0], [1], [0, 0, 1, 1], [], []>} : vector<8x128xf32>, vector<128x16xf32>, vector<8x16xf32> -> vector<8x16xf32>
    %cst_61 = arith.constant dense<0.000000e+00> : vector<16x16xf32>
    %129 = tpu.matmul %92, %128, %cst_61 {dimension_numbers = #tpu.dot_dimension_numbers<[1], [0], [0], [1], [0, 0, 1, 1], [], []>} : vector<16x8xf32>, vector<8x16xf32>, vector<16x16xf32> -> vector<16x16xf32>
    %cst_62 = arith.constant dense<0.000000e+00> : vector<16x16xf32>
    %130 = tpu.matmul %89, %129, %cst_62 {dimension_numbers = #tpu.dot_dimension_numbers<[1], [0], [0], [1], [0, 0, 1, 1], [], []>} : vector<16x16xf32>, vector<16x16xf32>, vector<16x16xf32> -> vector<16x16xf32>
    %cst_63 = arith.constant 0.000000e+00 : f32
    %131 = vector.broadcast %cst_63 : f32 to vector<16x16xf32>
    %132 = arith.maximumf %130, %131 : vector<16x16xf32>
    %cst_64 = arith.constant dense<0.000000e+00> : vector<16xf32>
    %133 = vector.multi_reduction <add>, %132, %cst_64 [0] : vector<16x16xf32> to vector<16xf32>
    %134 = vector.shape_cast %133 : vector<16xf32> to vector<1x16xf32>
    %cst_65 = arith.constant 1.600000e+01 : f32
    %135 = vector.broadcast %cst_65 : f32 to vector<1x16xf32>
    %136 = arith.divf %134, %135 : vector<1x16xf32>
    %137 = tpu.concatenate %79, %136 in 1 : vector<1x128xf32>, vector<1x16xf32> -> vector<1x144xf32>
    %c0_66 = arith.constant 0 : index
    %c0_67 = arith.constant 0 : index
    %138 = vector.load %arg7[%c0_66, %c0_67] : memref<144x512xf32, #tpu.memory_space<vmem>>, vector<144x512xf32>
    %cst_68 = arith.constant dense<0.000000e+00> : vector<1x512xf32>
    %139 = tpu.matmul %137, %138, %cst_68 {dimension_numbers = #tpu.dot_dimension_numbers<[1], [0], [0], [1], [0, 0, 1, 1], [], []>} : vector<1x144xf32>, vector<144x512xf32>, vector<1x512xf32> -> vector<1x512xf32>
    %c0_69 = arith.constant 0 : index
    %c0_70 = arith.constant 0 : index
    %140 = vector.load %arg8[%c0_69, %c0_70] : memref<1x512xf32, #tpu.memory_space<vmem>>, vector<1x512xf32>
    %141 = arith.addf %139, %140 : vector<1x512xf32>
    %142 = vector.extract_strided_slice %141 {offsets = [0, 0], sizes = [1, 128], strides = [1, 1]} : vector<1x512xf32> to vector<1x128xf32>
    %143 = vector.extract_strided_slice %141 {offsets = [0, 128], sizes = [1, 128], strides = [1, 1]} : vector<1x512xf32> to vector<1x128xf32>
    %144 = vector.extract_strided_slice %141 {offsets = [0, 256], sizes = [1, 128], strides = [1, 1]} : vector<1x512xf32> to vector<1x128xf32>
    %145 = vector.extract_strided_slice %141 {offsets = [0, 384], sizes = [1, 128], strides = [1, 1]} : vector<1x512xf32> to vector<1x128xf32>
    %146 = arith.negf %142 : vector<1x128xf32>
    %147 = math.exp %146 : vector<1x128xf32>
    %cst_71 = arith.constant 1.000000e+00 : f32
    %148 = vector.broadcast %cst_71 : f32 to vector<1x128xf32>
    %149 = arith.addf %148, %147 : vector<1x128xf32>
    %150 = arith.divf %148, %149 : vector<1x128xf32>
    %151 = arith.negf %143 : vector<1x128xf32>
    %152 = math.exp %151 : vector<1x128xf32>
    %cst_72 = arith.constant 1.000000e+00 : f32
    %153 = vector.broadcast %cst_72 : f32 to vector<1x128xf32>
    %154 = arith.addf %153, %152 : vector<1x128xf32>
    %155 = arith.divf %153, %154 : vector<1x128xf32>
    %156 = arith.mulf %150, %145 : vector<1x128xf32>
    %157 = arith.addf %144, %156 : vector<1x128xf32>
    %158 = math.tanh %157 : vector<1x128xf32>
    %cst_73 = arith.constant 1.000000e+00 : f32
    %159 = vector.broadcast %cst_73 : f32 to vector<1x128xf32>
    %160 = arith.subf %159, %155 : vector<1x128xf32>
    %161 = arith.mulf %160, %158 : vector<1x128xf32>
    %162 = arith.mulf %155, %79 : vector<1x128xf32>
    %163 = arith.addf %161, %162 : vector<1x128xf32>
    %c0_74 = arith.constant 0 : index
    %c0_75 = arith.constant 0 : index
    %164 = vector.load %arg10[%c0_74, %c0_75] : memref<16x128xf32, #tpu.memory_space<vmem>>, vector<16x128xf32>
    %165 = vector.broadcast %163 : vector<1x128xf32> to vector<16x128xf32>
    %166 = arith.mulf %164, %165 : vector<16x128xf32>
    %c0_76 = arith.constant 0 : index
    %c0_77 = arith.constant 0 : index
    %167 = vector.load %arg11[%c0_76, %c0_77] : memref<128x8xf32, #tpu.memory_space<vmem>>, vector<128x8xf32>
    %cst_78 = arith.constant dense<0.000000e+00> : vector<16x8xf32>
    %168 = tpu.matmul %166, %167, %cst_78 {dimension_numbers = #tpu.dot_dimension_numbers<[1], [0], [0], [1], [0, 0, 1, 1], [], []>} : vector<16x128xf32>, vector<128x8xf32>, vector<16x8xf32> -> vector<16x8xf32>
    %cst_79 = arith.constant dense<0.000000e+00> : vector<16x8xf32>
    %169 = tpu.matmul %132, %168, %cst_79 {dimension_numbers = #tpu.dot_dimension_numbers<[1], [0], [0], [1], [0, 0, 1, 1], [], []>} : vector<16x16xf32>, vector<16x8xf32>, vector<16x8xf32> -> vector<16x8xf32>
    %cst_80 = arith.constant dense<0.000000e+00> : vector<16x8xf32>
    %170 = tpu.matmul %89, %169, %cst_80 {dimension_numbers = #tpu.dot_dimension_numbers<[1], [0], [0], [1], [0, 0, 1, 1], [], []>} : vector<16x16xf32>, vector<16x8xf32>, vector<16x8xf32> -> vector<16x8xf32>
    %c2_i32 = arith.constant 2 : i32
    %171 = arith.index_cast %c2_i32 : i32 to index
    %c0_81 = arith.constant 0 : index
    %c0_82 = arith.constant 0 : index
    %172 = vector.load %arg0[%171, %c0_81, %c0_82] : memref<4x16x16xf32, #tpu.memory_space<vmem>>, vector<1x16x16xf32>
    %173 = vector.shape_cast %172 : vector<1x16x16xf32> to vector<16x16xf32>
    %174 = arith.index_cast %c2_i32 : i32 to index
    %c0_83 = arith.constant 0 : index
    %c0_84 = arith.constant 0 : index
    %175 = vector.load %arg1[%174, %c0_83, %c0_84] : memref<4x16x8xf32, #tpu.memory_space<vmem>>, vector<1x16x8xf32>
    %176 = vector.shape_cast %175 : vector<1x16x8xf32> to vector<16x8xf32>
    %cst_85 = arith.constant dense<0.000000e+00> : vector<8xf32>
    %177 = vector.multi_reduction <add>, %176, %cst_85 [0] : vector<16x8xf32> to vector<8xf32>
    %178 = vector.shape_cast %177 : vector<8xf32> to vector<1x8xf32>
    %cst_86 = arith.constant 1.600000e+01 : f32
    %179 = vector.broadcast %cst_86 : f32 to vector<1x8xf32>
    %180 = arith.divf %178, %179 : vector<1x8xf32>
    %181 = tpu.concatenate %123, %180 in 1 : vector<1x128xf32>, vector<1x8xf32> -> vector<1x136xf32>
    %c0_87 = arith.constant 0 : index
    %c0_88 = arith.constant 0 : index
    %182 = vector.load %arg2[%c0_87, %c0_88] : memref<136x512xf32, #tpu.memory_space<vmem>>, vector<136x512xf32>
    %cst_89 = arith.constant dense<0.000000e+00> : vector<1x512xf32>
    %183 = tpu.matmul %181, %182, %cst_89 {dimension_numbers = #tpu.dot_dimension_numbers<[1], [0], [0], [1], [0, 0, 1, 1], [], []>} : vector<1x136xf32>, vector<136x512xf32>, vector<1x512xf32> -> vector<1x512xf32>
    %c0_90 = arith.constant 0 : index
    %c0_91 = arith.constant 0 : index
    %184 = vector.load %arg3[%c0_90, %c0_91] : memref<1x512xf32, #tpu.memory_space<vmem>>, vector<1x512xf32>
    %185 = arith.addf %183, %184 : vector<1x512xf32>
    %186 = vector.extract_strided_slice %185 {offsets = [0, 0], sizes = [1, 128], strides = [1, 1]} : vector<1x512xf32> to vector<1x128xf32>
    %187 = vector.extract_strided_slice %185 {offsets = [0, 128], sizes = [1, 128], strides = [1, 1]} : vector<1x512xf32> to vector<1x128xf32>
    %188 = vector.extract_strided_slice %185 {offsets = [0, 256], sizes = [1, 128], strides = [1, 1]} : vector<1x512xf32> to vector<1x128xf32>
    %189 = vector.extract_strided_slice %185 {offsets = [0, 384], sizes = [1, 128], strides = [1, 1]} : vector<1x512xf32> to vector<1x128xf32>
    %190 = arith.negf %186 : vector<1x128xf32>
    %191 = math.exp %190 : vector<1x128xf32>
    %cst_92 = arith.constant 1.000000e+00 : f32
    %192 = vector.broadcast %cst_92 : f32 to vector<1x128xf32>
    %193 = arith.addf %192, %191 : vector<1x128xf32>
    %194 = arith.divf %192, %193 : vector<1x128xf32>
    %195 = arith.negf %187 : vector<1x128xf32>
    %196 = math.exp %195 : vector<1x128xf32>
    %cst_93 = arith.constant 1.000000e+00 : f32
    %197 = vector.broadcast %cst_93 : f32 to vector<1x128xf32>
    %198 = arith.addf %197, %196 : vector<1x128xf32>
    %199 = arith.divf %197, %198 : vector<1x128xf32>
    %200 = arith.mulf %194, %189 : vector<1x128xf32>
    %201 = arith.addf %188, %200 : vector<1x128xf32>
    %202 = math.tanh %201 : vector<1x128xf32>
    %cst_94 = arith.constant 1.000000e+00 : f32
    %203 = vector.broadcast %cst_94 : f32 to vector<1x128xf32>
    %204 = arith.subf %203, %199 : vector<1x128xf32>
    %205 = arith.mulf %204, %202 : vector<1x128xf32>
    %206 = arith.mulf %199, %123 : vector<1x128xf32>
    %207 = arith.addf %205, %206 : vector<1x128xf32>
    %c0_95 = arith.constant 0 : index
    %c0_96 = arith.constant 0 : index
    %208 = vector.load %arg5[%c0_95, %c0_96] : memref<8x128xf32, #tpu.memory_space<vmem>>, vector<8x128xf32>
    %209 = vector.broadcast %207 : vector<1x128xf32> to vector<8x128xf32>
    %210 = arith.mulf %208, %209 : vector<8x128xf32>
    %c0_97 = arith.constant 0 : index
    %c0_98 = arith.constant 0 : index
    %211 = vector.load %arg6[%c0_97, %c0_98] : memref<128x16xf32, #tpu.memory_space<vmem>>, vector<128x16xf32>
    %cst_99 = arith.constant dense<0.000000e+00> : vector<8x16xf32>
    %212 = tpu.matmul %210, %211, %cst_99 {dimension_numbers = #tpu.dot_dimension_numbers<[1], [0], [0], [1], [0, 0, 1, 1], [], []>} : vector<8x128xf32>, vector<128x16xf32>, vector<8x16xf32> -> vector<8x16xf32>
    %cst_100 = arith.constant dense<0.000000e+00> : vector<16x16xf32>
    %213 = tpu.matmul %176, %212, %cst_100 {dimension_numbers = #tpu.dot_dimension_numbers<[1], [0], [0], [1], [0, 0, 1, 1], [], []>} : vector<16x8xf32>, vector<8x16xf32>, vector<16x16xf32> -> vector<16x16xf32>
    %cst_101 = arith.constant dense<0.000000e+00> : vector<16x16xf32>
    %214 = tpu.matmul %173, %213, %cst_101 {dimension_numbers = #tpu.dot_dimension_numbers<[1], [0], [0], [1], [0, 0, 1, 1], [], []>} : vector<16x16xf32>, vector<16x16xf32>, vector<16x16xf32> -> vector<16x16xf32>
    %cst_102 = arith.constant 0.000000e+00 : f32
    %215 = vector.broadcast %cst_102 : f32 to vector<16x16xf32>
    %216 = arith.maximumf %214, %215 : vector<16x16xf32>
    %cst_103 = arith.constant dense<0.000000e+00> : vector<16xf32>
    %217 = vector.multi_reduction <add>, %216, %cst_103 [0] : vector<16x16xf32> to vector<16xf32>
    %218 = vector.shape_cast %217 : vector<16xf32> to vector<1x16xf32>
    %cst_104 = arith.constant 1.600000e+01 : f32
    %219 = vector.broadcast %cst_104 : f32 to vector<1x16xf32>
    %220 = arith.divf %218, %219 : vector<1x16xf32>
    %221 = tpu.concatenate %163, %220 in 1 : vector<1x128xf32>, vector<1x16xf32> -> vector<1x144xf32>
    %c0_105 = arith.constant 0 : index
    %c0_106 = arith.constant 0 : index
    %222 = vector.load %arg7[%c0_105, %c0_106] : memref<144x512xf32, #tpu.memory_space<vmem>>, vector<144x512xf32>
    %cst_107 = arith.constant dense<0.000000e+00> : vector<1x512xf32>
    %223 = tpu.matmul %221, %222, %cst_107 {dimension_numbers = #tpu.dot_dimension_numbers<[1], [0], [0], [1], [0, 0, 1, 1], [], []>} : vector<1x144xf32>, vector<144x512xf32>, vector<1x512xf32> -> vector<1x512xf32>
    %c0_108 = arith.constant 0 : index
    %c0_109 = arith.constant 0 : index
    %224 = vector.load %arg8[%c0_108, %c0_109] : memref<1x512xf32, #tpu.memory_space<vmem>>, vector<1x512xf32>
    %225 = arith.addf %223, %224 : vector<1x512xf32>
    %226 = vector.extract_strided_slice %225 {offsets = [0, 0], sizes = [1, 128], strides = [1, 1]} : vector<1x512xf32> to vector<1x128xf32>
    %227 = vector.extract_strided_slice %225 {offsets = [0, 128], sizes = [1, 128], strides = [1, 1]} : vector<1x512xf32> to vector<1x128xf32>
    %228 = vector.extract_strided_slice %225 {offsets = [0, 256], sizes = [1, 128], strides = [1, 1]} : vector<1x512xf32> to vector<1x128xf32>
    %229 = vector.extract_strided_slice %225 {offsets = [0, 384], sizes = [1, 128], strides = [1, 1]} : vector<1x512xf32> to vector<1x128xf32>
    %230 = arith.negf %226 : vector<1x128xf32>
    %231 = math.exp %230 : vector<1x128xf32>
    %cst_110 = arith.constant 1.000000e+00 : f32
    %232 = vector.broadcast %cst_110 : f32 to vector<1x128xf32>
    %233 = arith.addf %232, %231 : vector<1x128xf32>
    %234 = arith.divf %232, %233 : vector<1x128xf32>
    %235 = arith.negf %227 : vector<1x128xf32>
    %236 = math.exp %235 : vector<1x128xf32>
    %cst_111 = arith.constant 1.000000e+00 : f32
    %237 = vector.broadcast %cst_111 : f32 to vector<1x128xf32>
    %238 = arith.addf %237, %236 : vector<1x128xf32>
    %239 = arith.divf %237, %238 : vector<1x128xf32>
    %240 = arith.mulf %234, %229 : vector<1x128xf32>
    %241 = arith.addf %228, %240 : vector<1x128xf32>
    %242 = math.tanh %241 : vector<1x128xf32>
    %cst_112 = arith.constant 1.000000e+00 : f32
    %243 = vector.broadcast %cst_112 : f32 to vector<1x128xf32>
    %244 = arith.subf %243, %239 : vector<1x128xf32>
    %245 = arith.mulf %244, %242 : vector<1x128xf32>
    %246 = arith.mulf %239, %163 : vector<1x128xf32>
    %247 = arith.addf %245, %246 : vector<1x128xf32>
    %c0_113 = arith.constant 0 : index
    %c0_114 = arith.constant 0 : index
    %248 = vector.load %arg10[%c0_113, %c0_114] : memref<16x128xf32, #tpu.memory_space<vmem>>, vector<16x128xf32>
    %249 = vector.broadcast %247 : vector<1x128xf32> to vector<16x128xf32>
    %250 = arith.mulf %248, %249 : vector<16x128xf32>
    %c0_115 = arith.constant 0 : index
    %c0_116 = arith.constant 0 : index
    %251 = vector.load %arg11[%c0_115, %c0_116] : memref<128x8xf32, #tpu.memory_space<vmem>>, vector<128x8xf32>
    %cst_117 = arith.constant dense<0.000000e+00> : vector<16x8xf32>
    %252 = tpu.matmul %250, %251, %cst_117 {dimension_numbers = #tpu.dot_dimension_numbers<[1], [0], [0], [1], [0, 0, 1, 1], [], []>} : vector<16x128xf32>, vector<128x8xf32>, vector<16x8xf32> -> vector<16x8xf32>
    %cst_118 = arith.constant dense<0.000000e+00> : vector<16x8xf32>
    %253 = tpu.matmul %216, %252, %cst_118 {dimension_numbers = #tpu.dot_dimension_numbers<[1], [0], [0], [1], [0, 0, 1, 1], [], []>} : vector<16x16xf32>, vector<16x8xf32>, vector<16x8xf32> -> vector<16x8xf32>
    %cst_119 = arith.constant dense<0.000000e+00> : vector<16x8xf32>
    %254 = tpu.matmul %173, %253, %cst_119 {dimension_numbers = #tpu.dot_dimension_numbers<[1], [0], [0], [1], [0, 0, 1, 1], [], []>} : vector<16x16xf32>, vector<16x8xf32>, vector<16x8xf32> -> vector<16x8xf32>
    %c3_i32 = arith.constant 3 : i32
    %255 = arith.index_cast %c3_i32 : i32 to index
    %c0_120 = arith.constant 0 : index
    %c0_121 = arith.constant 0 : index
    %256 = vector.load %arg0[%255, %c0_120, %c0_121] : memref<4x16x16xf32, #tpu.memory_space<vmem>>, vector<1x16x16xf32>
    %257 = vector.shape_cast %256 : vector<1x16x16xf32> to vector<16x16xf32>
    %258 = arith.index_cast %c3_i32 : i32 to index
    %c0_122 = arith.constant 0 : index
    %c0_123 = arith.constant 0 : index
    %259 = vector.load %arg1[%258, %c0_122, %c0_123] : memref<4x16x8xf32, #tpu.memory_space<vmem>>, vector<1x16x8xf32>
    %260 = vector.shape_cast %259 : vector<1x16x8xf32> to vector<16x8xf32>
    %cst_124 = arith.constant dense<0.000000e+00> : vector<8xf32>
    %261 = vector.multi_reduction <add>, %260, %cst_124 [0] : vector<16x8xf32> to vector<8xf32>
    %262 = vector.shape_cast %261 : vector<8xf32> to vector<1x8xf32>
    %cst_125 = arith.constant 1.600000e+01 : f32
    %263 = vector.broadcast %cst_125 : f32 to vector<1x8xf32>
    %264 = arith.divf %262, %263 : vector<1x8xf32>
    %265 = tpu.concatenate %207, %264 in 1 : vector<1x128xf32>, vector<1x8xf32> -> vector<1x136xf32>
    %c0_126 = arith.constant 0 : index
    %c0_127 = arith.constant 0 : index
    %266 = vector.load %arg2[%c0_126, %c0_127] : memref<136x512xf32, #tpu.memory_space<vmem>>, vector<136x512xf32>
    %cst_128 = arith.constant dense<0.000000e+00> : vector<1x512xf32>
    %267 = tpu.matmul %265, %266, %cst_128 {dimension_numbers = #tpu.dot_dimension_numbers<[1], [0], [0], [1], [0, 0, 1, 1], [], []>} : vector<1x136xf32>, vector<136x512xf32>, vector<1x512xf32> -> vector<1x512xf32>
    %c0_129 = arith.constant 0 : index
    %c0_130 = arith.constant 0 : index
    %268 = vector.load %arg3[%c0_129, %c0_130] : memref<1x512xf32, #tpu.memory_space<vmem>>, vector<1x512xf32>
    %269 = arith.addf %267, %268 : vector<1x512xf32>
    %270 = vector.extract_strided_slice %269 {offsets = [0, 0], sizes = [1, 128], strides = [1, 1]} : vector<1x512xf32> to vector<1x128xf32>
    %271 = vector.extract_strided_slice %269 {offsets = [0, 128], sizes = [1, 128], strides = [1, 1]} : vector<1x512xf32> to vector<1x128xf32>
    %272 = vector.extract_strided_slice %269 {offsets = [0, 256], sizes = [1, 128], strides = [1, 1]} : vector<1x512xf32> to vector<1x128xf32>
    %273 = vector.extract_strided_slice %269 {offsets = [0, 384], sizes = [1, 128], strides = [1, 1]} : vector<1x512xf32> to vector<1x128xf32>
    %274 = arith.negf %270 : vector<1x128xf32>
    %275 = math.exp %274 : vector<1x128xf32>
    %cst_131 = arith.constant 1.000000e+00 : f32
    %276 = vector.broadcast %cst_131 : f32 to vector<1x128xf32>
    %277 = arith.addf %276, %275 : vector<1x128xf32>
    %278 = arith.divf %276, %277 : vector<1x128xf32>
    %279 = arith.negf %271 : vector<1x128xf32>
    %280 = math.exp %279 : vector<1x128xf32>
    %cst_132 = arith.constant 1.000000e+00 : f32
    %281 = vector.broadcast %cst_132 : f32 to vector<1x128xf32>
    %282 = arith.addf %281, %280 : vector<1x128xf32>
    %283 = arith.divf %281, %282 : vector<1x128xf32>
    %284 = arith.mulf %278, %273 : vector<1x128xf32>
    %285 = arith.addf %272, %284 : vector<1x128xf32>
    %286 = math.tanh %285 : vector<1x128xf32>
    %cst_133 = arith.constant 1.000000e+00 : f32
    %287 = vector.broadcast %cst_133 : f32 to vector<1x128xf32>
    %288 = arith.subf %287, %283 : vector<1x128xf32>
    %289 = arith.mulf %288, %286 : vector<1x128xf32>
    %290 = arith.mulf %283, %207 : vector<1x128xf32>
    %291 = arith.addf %289, %290 : vector<1x128xf32>
    %c0_134 = arith.constant 0 : index
    %c0_135 = arith.constant 0 : index
    %292 = vector.load %arg5[%c0_134, %c0_135] : memref<8x128xf32, #tpu.memory_space<vmem>>, vector<8x128xf32>
    %293 = vector.broadcast %291 : vector<1x128xf32> to vector<8x128xf32>
    %294 = arith.mulf %292, %293 : vector<8x128xf32>
    %c0_136 = arith.constant 0 : index
    %c0_137 = arith.constant 0 : index
    %295 = vector.load %arg6[%c0_136, %c0_137] : memref<128x16xf32, #tpu.memory_space<vmem>>, vector<128x16xf32>
    %cst_138 = arith.constant dense<0.000000e+00> : vector<8x16xf32>
    %296 = tpu.matmul %294, %295, %cst_138 {dimension_numbers = #tpu.dot_dimension_numbers<[1], [0], [0], [1], [0, 0, 1, 1], [], []>} : vector<8x128xf32>, vector<128x16xf32>, vector<8x16xf32> -> vector<8x16xf32>
    %cst_139 = arith.constant dense<0.000000e+00> : vector<16x16xf32>
    %297 = tpu.matmul %260, %296, %cst_139 {dimension_numbers = #tpu.dot_dimension_numbers<[1], [0], [0], [1], [0, 0, 1, 1], [], []>} : vector<16x8xf32>, vector<8x16xf32>, vector<16x16xf32> -> vector<16x16xf32>
    %cst_140 = arith.constant dense<0.000000e+00> : vector<16x16xf32>
    %298 = tpu.matmul %257, %297, %cst_140 {dimension_numbers = #tpu.dot_dimension_numbers<[1], [0], [0], [1], [0, 0, 1, 1], [], []>} : vector<16x16xf32>, vector<16x16xf32>, vector<16x16xf32> -> vector<16x16xf32>
    %cst_141 = arith.constant 0.000000e+00 : f32
    %299 = vector.broadcast %cst_141 : f32 to vector<16x16xf32>
    %300 = arith.maximumf %298, %299 : vector<16x16xf32>
    %cst_142 = arith.constant dense<0.000000e+00> : vector<16xf32>
    %301 = vector.multi_reduction <add>, %300, %cst_142 [0] : vector<16x16xf32> to vector<16xf32>
    %302 = vector.shape_cast %301 : vector<16xf32> to vector<1x16xf32>
    %cst_143 = arith.constant 1.600000e+01 : f32
    %303 = vector.broadcast %cst_143 : f32 to vector<1x16xf32>
    %304 = arith.divf %302, %303 : vector<1x16xf32>
    %305 = tpu.concatenate %247, %304 in 1 : vector<1x128xf32>, vector<1x16xf32> -> vector<1x144xf32>
    %c0_144 = arith.constant 0 : index
    %c0_145 = arith.constant 0 : index
    %306 = vector.load %arg7[%c0_144, %c0_145] : memref<144x512xf32, #tpu.memory_space<vmem>>, vector<144x512xf32>
    %cst_146 = arith.constant dense<0.000000e+00> : vector<1x512xf32>
    %307 = tpu.matmul %305, %306, %cst_146 {dimension_numbers = #tpu.dot_dimension_numbers<[1], [0], [0], [1], [0, 0, 1, 1], [], []>} : vector<1x144xf32>, vector<144x512xf32>, vector<1x512xf32> -> vector<1x512xf32>
    %c0_147 = arith.constant 0 : index
    %c0_148 = arith.constant 0 : index
    %308 = vector.load %arg8[%c0_147, %c0_148] : memref<1x512xf32, #tpu.memory_space<vmem>>, vector<1x512xf32>
    %309 = arith.addf %307, %308 : vector<1x512xf32>
    %310 = vector.extract_strided_slice %309 {offsets = [0, 0], sizes = [1, 128], strides = [1, 1]} : vector<1x512xf32> to vector<1x128xf32>
    %311 = vector.extract_strided_slice %309 {offsets = [0, 128], sizes = [1, 128], strides = [1, 1]} : vector<1x512xf32> to vector<1x128xf32>
    %312 = vector.extract_strided_slice %309 {offsets = [0, 256], sizes = [1, 128], strides = [1, 1]} : vector<1x512xf32> to vector<1x128xf32>
    %313 = vector.extract_strided_slice %309 {offsets = [0, 384], sizes = [1, 128], strides = [1, 1]} : vector<1x512xf32> to vector<1x128xf32>
    %314 = arith.negf %310 : vector<1x128xf32>
    %315 = math.exp %314 : vector<1x128xf32>
    %cst_149 = arith.constant 1.000000e+00 : f32
    %316 = vector.broadcast %cst_149 : f32 to vector<1x128xf32>
    %317 = arith.addf %316, %315 : vector<1x128xf32>
    %318 = arith.divf %316, %317 : vector<1x128xf32>
    %319 = arith.negf %311 : vector<1x128xf32>
    %320 = math.exp %319 : vector<1x128xf32>
    %cst_150 = arith.constant 1.000000e+00 : f32
    %321 = vector.broadcast %cst_150 : f32 to vector<1x128xf32>
    %322 = arith.addf %321, %320 : vector<1x128xf32>
    %323 = arith.divf %321, %322 : vector<1x128xf32>
    %324 = arith.mulf %318, %313 : vector<1x128xf32>
    %325 = arith.addf %312, %324 : vector<1x128xf32>
    %326 = math.tanh %325 : vector<1x128xf32>
    %cst_151 = arith.constant 1.000000e+00 : f32
    %327 = vector.broadcast %cst_151 : f32 to vector<1x128xf32>
    %328 = arith.subf %327, %323 : vector<1x128xf32>
    %329 = arith.mulf %328, %326 : vector<1x128xf32>
    %330 = arith.mulf %323, %247 : vector<1x128xf32>
    %331 = arith.addf %329, %330 : vector<1x128xf32>
    %c0_152 = arith.constant 0 : index
    %c0_153 = arith.constant 0 : index
    %332 = vector.load %arg10[%c0_152, %c0_153] : memref<16x128xf32, #tpu.memory_space<vmem>>, vector<16x128xf32>
    %333 = vector.broadcast %331 : vector<1x128xf32> to vector<16x128xf32>
    %334 = arith.mulf %332, %333 : vector<16x128xf32>
    %c0_154 = arith.constant 0 : index
    %c0_155 = arith.constant 0 : index
    %335 = vector.load %arg11[%c0_154, %c0_155] : memref<128x8xf32, #tpu.memory_space<vmem>>, vector<128x8xf32>
    %cst_156 = arith.constant dense<0.000000e+00> : vector<16x8xf32>
    %336 = tpu.matmul %334, %335, %cst_156 {dimension_numbers = #tpu.dot_dimension_numbers<[1], [0], [0], [1], [0, 0, 1, 1], [], []>} : vector<16x128xf32>, vector<128x8xf32>, vector<16x8xf32> -> vector<16x8xf32>
    %cst_157 = arith.constant dense<0.000000e+00> : vector<16x8xf32>
    %337 = tpu.matmul %300, %336, %cst_157 {dimension_numbers = #tpu.dot_dimension_numbers<[1], [0], [0], [1], [0, 0, 1, 1], [], []>} : vector<16x16xf32>, vector<16x8xf32>, vector<16x8xf32> -> vector<16x8xf32>
    %cst_158 = arith.constant dense<0.000000e+00> : vector<16x8xf32>
    %338 = tpu.matmul %257, %337, %cst_158 {dimension_numbers = #tpu.dot_dimension_numbers<[1], [0], [0], [1], [0, 0, 1, 1], [], []>} : vector<16x16xf32>, vector<16x8xf32>, vector<16x8xf32> -> vector<16x8xf32>
    %c4_i32 = arith.constant 4 : i32
    %c0_159 = arith.constant 0 : index
    %c0_160 = arith.constant 0 : index
    %339 = vector.load %arg12[%c0_159, %c0_160] : memref<16x8xf32, #tpu.memory_space<vmem>>, vector<16x8xf32>
    tpu.vector_store %arg12[%c0_159, %c0_160], %338 {strides = array<i32>} : memref<16x8xf32, #tpu.memory_space<vmem>>, vector<16x8xf32>,
    return
  }
}

</mosaic_0001>

<bundles_post_ra>
// kernel: tpu_custom_call.1
= control target key start
LH: loop header
LB: loop body
LE: loop exit
PB: predicated region body
PF: predicated region fallthrough
CT: control target
= control target key end

     0   :  { %17 = vsyncpa [#allocation3], 0  ;;  %s5192_s0 = inlined_call_operand.vmem [shape: f32[4,16,16], index: 0, kind: input, shape index: {}]   ;;  %s5193_s1 = inlined_call_operand.vmem [shape: f32[4,16,8], index: 1, kind: input, shape index: {}]   ;;  %s5194_s2 = inlined_call_operand.hbm [shape: f32[136,512], index: 2, kind: input, shape index: {}]   ;;  %s5195_s3 = inlined_call_operand.vmem [shape: f32[1,512], index: 3, kind: input, shape index: {}]   ;;  %s5196_s4 = inlined_call_operand.vmem [shape: f32[1,128], index: 4, kind: input, shape index: {}]   ;;  %s5197_s5 = inlined_call_operand.vmem [shape: f32[8,128], index: 5, kind: input, shape index: {}]   ;;  %s5198_s6 = inlined_call_operand.vmem [shape: f32[128,16], index: 6, kind: input, shape index: {}]   ;;  %s5199_s7 = inlined_call_operand.hbm [shape: f32[144,512], index: 7, kind: input, shape index: {}]   ;;  %s5200_s8 = inlined_call_operand.vmem [shape: f32[1,512], index: 8, kind: input, shape index: {}]   ;;  %s5201_s9 = inlined_call_operand.vmem [shape: f32[1,128], index: 9, kind: input, shape index: {}]   ;;  %s5202_s10 = inlined_call_operand.vmem [shape: f32[16,128], index: 10, kind: input, shape index: {}]   ;;  %s5203_s11 = inlined_call_operand.vmem [shape: f32[128,8], index: 11, kind: input, shape index: {}]   ;;  %s5204_s12 = inlined_call_operand.vmem [shape: f32[16,8], index: 12, kind: output, shape index: {}]  }
   0x1   :  { %18 = vsyncpa [#allocation5], 0  ;;  %s4167_s21 = smov [#allocation2]   ;;  %s4119_s25 = scalar_lea.hbm %s5194_s2, 8704 }
   0x2   :  { %s28_s22 = sshll.u32 %s4167_s21, 4  ;;  %p4120_p0 = scmp.ne.s32.totalorder %s5194_s2, %s4119_s25  ;;  %s29_s22 = int_to_ptr.vmem [resolvable:$true] %s28_s22 }
   0x3   :  { %p4123_p1 = scmp.lt.u32.totalorder %s4119_s25, %s5194_s2 }
   0x5   :  { %p4125_p2 = pnand %p4123_p1, %p4120_p0 }
   0x7   :  { %4128 = shalt.err (!%p4125_p2)
}
   0x8   :  { %s4129_s30 = scalar_lea.vmem %s29_s22, 8704  ;;  %p4134_p4 = scmp.lt.s32.totalorder %s29_s22, %s29_s22 }
   0x9   :  { %p4130_p3 = scmp.ne.s32.totalorder %s29_s22, %s4129_s30  ;;  %p4135_p5 = scmp.lt.s32.totalorder %s4129_s30, %s4129_s30 }
   0xb   :  { %p4136_p6 = por %p4135_p5, %p4134_p4 }
   0xd   :  { %p4137_p7 = pnand %p4136_p6, %p4130_p3 }
   0xf   :  { %4140 = shalt.err (!%p4137_p7)
}
  0x10   :  { %s4168_s13 = smov 512   ;;  %s4169_s14 = smov 32  }
  0x11   :  { %34 = dma.hbm_to_vmem [thread:$0]  %s5194_s2, 8704, %s29_s22, [#allocation3], %s4168_s13, %s4168_s13, %s4169_s14  }
  0x12   :  { %s4170_s17 = smov [#allocation4]   ;;  %s4141_s21 = scalar_lea.hbm %s5199_s7, 9216 }
  0x13   :  { %s48_s18 = sshll.u32 %s4170_s17, 4  ;;  %p4142_p8 = scmp.ne.s32.totalorder %s5199_s7, %s4141_s21  ;;  %s49_s18 = int_to_ptr.vmem [resolvable:$true] %s48_s18 }
  0x14   :  { %p4145_p9 = scmp.lt.u32.totalorder %s4141_s21, %s5199_s7 }
  0x16   :  { %p4147_p10 = pnand %p4145_p9, %p4142_p8 }
  0x18   :  { %4150 = shalt.err (!%p4147_p10)
}
  0x19   :  { %s4151_s27 = scalar_lea.vmem %s49_s18, 9216  ;;  %p4156_p12 = scmp.lt.s32.totalorder %s49_s18, %s49_s18 }
  0x1a   :  { %p4152_p11 = scmp.ne.s32.totalorder %s49_s18, %s4151_s27  ;;  %p4157_p13 = scmp.lt.s32.totalorder %s4151_s27, %s4151_s27 }
  0x1c   :  { %p4158_p0 = por %p4157_p13, %p4156_p12 }
  0x1e   :  { %p4159_p1 = pnand %p4158_p0, %p4152_p11 }
  0x20   :  { %4162 = shalt.err (!%p4159_p1)
}
  0x21   :  { %54 = dma.hbm_to_vmem [thread:$0]  %s5199_s7, 9216, %s49_s18, [#allocation5], %s4168_s13, %s4168_s13, %s4169_s14  }
  0x22   :  { %4163 = dma.done.wait [#allocation3], 8704  }
  0x23   :  { %4164 = vsyncadd [#allocation3], 4294958592 }
  0x24   :  { %4165 = dma.done.wait [#allocation5], 9216  }
  0x25   :  { %4166 = vsyncadd [#allocation5], 4294958080  ;;  %v88_v0 = vld [vmem:[#allocation2 + $0x8] sm:$0xff]  ;;  %v87_v2 = vld [vmem:[#allocation2] sm:$0xff]  ;;  %vm75_vm0 = vcmask 64512   ;;  %vm4172_vm1 = vmmov 0  }
  0x26   :  { %v92_v1 = vld [vmem:[#allocation2 + $0x28] sm:$0xff]  ;;  %v91_v4 = vld [vmem:[#allocation2 + $0x20] sm:$0xff]  ;;  %v90_v21 = vld [vmem:[#allocation2 + $0x18] sm:$0xff]  ;;  %vm514_vm2 = vcmask 130048  }
  0x27   :  { %v4263_v3 = vpack.c.bf16 %v92_v1, %v88_v0  ;;  %v96_v5 = vld [vmem:[#allocation2 + $0x48] sm:$0xff]  ;;  %v4265_v7 = vpack.c.bf16 %v91_v4, %v87_v2  ;;  %v95_v9 = vld [vmem:[#allocation2 + $0x40] sm:$0xff]  ;;  %v94_v25 = vld [vmem:[#allocation2 + $0x38] sm:$0xff] }
  0x28   :  { %v100_v6 = vld [vmem:[#allocation2 + $0x68] sm:$0xff]  ;;  %v99_v10 = vld [vmem:[#allocation2 + $0x60] sm:$0xff]  ;;  %v4282_v27 = vpack.c.bf16 %v94_v25, %v90_v21  ;;  %v89_v28 = vld [vmem:[#allocation2 + $0x10] sm:$0xff] }
  0x29   :  { %5330 = vst [vmem:[#allocation8_spill] sm:$0xff] %v4263_v3  ;;  %v4267_v8 = vpack.c.bf16 %v100_v6, %v96_v5  ;;  %v104_v11 = vld [vmem:[#allocation2 + $0x88] sm:$0xff]  ;;  %3332 = vmatprep.subr.bf16.mxu0 %v4263_v3  ;;  %v4271_v13 = vpack.c.bf16 %v99_v10, %v95_v9  ;;  %v103_v15 = vld [vmem:[#allocation2 + $0x80] sm:$0xff]  ;;  %v93_v29 = vld [vmem:[#allocation2 + $0x30] sm:$0xff] }
  0x2a   :  { %v108_v12 = vld [vmem:[#allocation2 + $0xa8] sm:$0xff]  ;;  %3334 = vmatpush1.bf16.msra.mxu0 %v4265_v7  ;;  %v107_v16 = vld [vmem:[#allocation2 + $0xa0] sm:$0xff]  ;;  %5331 = vst [vmem:[#allocation9_spill] sm:$0xff] %v4282_v27  ;;  %v4284_v30 = vpack.c.bf16 %v93_v29, %v89_v28  ;;  %v98_v31 = vld [vmem:[#allocation2 + $0x58] sm:$0xff]  ;;  %3364 = vmatprep.subr.bf16.mxu1 %v4282_v27 }
  0x2b   :  { %3336 = vmatprep.subr.bf16.mxu0 %v4267_v8  ;;  %v4274_v14 = vpack.c.bf16 %v108_v12, %v104_v11  ;;  %v112_v17 = vld [vmem:[#allocation2 + $0xc8] sm:$0xff]  ;;  %v4277_v19 = vpack.c.bf16 %v107_v16, %v103_v15  ;;  %v111_v20 = vld [vmem:[#allocation2 + $0xc0] sm:$0xff]  ;;  %v102_v32 = vld [vmem:[#allocation2 + $0x78] sm:$0xff] }
  0x2c   :  { %v116_v18 = vld [vmem:[#allocation2 + $0xe8] sm:$0xff]  ;;  %v115_v23 = vld [vmem:[#allocation2 + $0xe0] sm:$0xff]  ;;  %v4290_v36 = vpack.c.bf16 %v102_v32, %v98_v31  ;;  %v97_v37 = vld [vmem:[#allocation2 + $0x50] sm:$0xff]  ;;  %3366 = vmatpush1.bf16.msra.mxu1 %v4284_v30 }
  0x2d   :  { %v4280_v22 = vpack.c.bf16 %v116_v18, %v112_v17  ;;  %v120_v24 = vld [vmem:[#allocation2 + $0x108] sm:$0xff]  ;;  %v4287_v33 = vpack.c.bf16 %v115_v23, %v111_v20  ;;  %v119_v34 = vld [vmem:[#allocation2 + $0x100] sm:$0xff]  ;;  %v101_v40 = vld [vmem:[#allocation2 + $0x70] sm:$0xff] }
  0x2e   :  { %3338 = vmatpush1.bf16.msra.mxu0 %v4271_v13  ;;  %v124_v26 = vld [vmem:[#allocation2 + $0x128] sm:$0xff]  ;;  %v123_v35 = vld [vmem:[#allocation2 + $0x120] sm:$0xff]  ;;  %v106_v41 = vld [vmem:[#allocation2 + $0x98] sm:$0xff]  ;;  %3368 = vmatprep.subr.bf16.mxu1 %v4290_v36  ;;  %v4297_v43 = vpack.c.bf16 %v101_v40, %v97_v37 }
  0x2f   :  { %3340 = vmatprep.subr.bf16.mxu0 %v4274_v14  ;;  %v4293_v38 = vpack.c.bf16 %v124_v26, %v120_v24  ;;  %v128_v39 = vld [vmem:[#allocation2 + $0x148] sm:$0xff]  ;;  %v110_v44 = vld [vmem:[#allocation2 + $0xb8] sm:$0xff]  ;;  %v4302_v45 = vld [vmem:[%s5193_s1] sm:$0xff]  ;;  %v4314_v51 = vpack.c.bf16 %v123_v35, %v119_v34 }
  0x30   :  { %v132_v42 = vld [vmem:[#allocation2 + $0x168] sm:$0xff]  ;;  %v4304_v46 = vpack.c.bf16 %v110_v44, %v106_v41  ;;  %v76_v48 = vsel %vm75_vm0, %v4302_v45, 0.0  ;;  %v105_v49 = vld [vmem:[#allocation2 + $0x90] sm:$0xff]  ;;  %v114_v53 = vld [vmem:[#allocation2 + $0xd8] sm:$0xff]  ;;  %3370 = vmatpush1.bf16.msra.mxu1 %v4297_v43 }
  0x31   :  { %v4309_v47 = vld [vmem:[%s5193_s1 + $0x8] sm:$0xff]  ;;  %v109_v50 = vld [vmem:[#allocation2 + $0xb0] sm:$0xff]  ;;  %v118_v54 = vld [vmem:[#allocation2 + $0xf8] sm:$0xff]  ;;  %v4319_v55 = vpack.c.bf16 %v132_v42, %v128_v39 }
  0x32   :  { %3342 = vmatpush1.bf16.msra.mxu0 %v4277_v19  ;;  %v77_v52 = vsel %vm75_vm0, %v4309_v47, 0.0  ;;  %v127_v56 = vld [vmem:[#allocation2 + $0x140] sm:$0xff]  ;;  %v136_v58 = vld [vmem:[#allocation2 + $0x188] sm:$0xff]  ;;  %v4322_v60 = vpack.c.bf16 %v109_v50, %v105_v49  ;;  %3372 = vmatprep.subr.bf16.mxu1 %v4304_v46  ;;  %v4325_v62 = vpack.c.bf16 %v118_v54, %v114_v53  ;;  %v113_v63 = vld [vmem:[#allocation2 + $0xd0] sm:$0xff] }
  0x33   :  { %3344 = vmatprep.subr.bf16.mxu0 %v4280_v22  ;;  %v131_v57 = vld [vmem:[#allocation2 + $0x160] sm:$0xff]  ;;  %v78_v59 = vadd.f32 %v77_v52, %v76_v48  ;;  %v140_v61 = vld [vmem:[#allocation2 + $0x1a8] sm:$0xff]  ;;  %v117_v0 = vld [vmem:[#allocation2 + $0xf0] sm:$0xff] }
  0x34   :  { %v122_v2 = vld [vmem:[#allocation2 + $0x118] sm:$0xff]  ;;  %v4328_v5 = vpack.c.bf16 %v131_v57, %v127_v56  ;;  %v4331_v6 = vpack.c.bf16 %v140_v61, %v136_v58  ;;  %v135_v9 = vld [vmem:[#allocation2 + $0x180] sm:$0xff]  ;;  %v144_v11 = vld [vmem:[#allocation2 + $0x1c8] sm:$0xff]  ;;  %3374 = vmatpush1.bf16.msra.mxu1 %v4322_v60  ;;  %v4334_v15 = vpack.c.bf16 %v117_v0, %v113_v63 }
  0x35   :  { %v79_v1 = vrot.slane %v78_v59, 4  ;;  %v126_v4 = vld [vmem:[#allocation2 + $0x138] sm:$0xff]  ;;  %v139_v10 = vld [vmem:[#allocation2 + $0x1a0] sm:$0xff]  ;;  %v148_v16 = vld [vmem:[#allocation2 + $0x1e8] sm:$0xff]  ;;  %3376 = vmatprep.subr.bf16.mxu1 %v4325_v62 }
  0x36   :  { %3346 = vmatpush1.bf16.msra.mxu0 %v4287_v33  ;;  %v4337_v17 = vpack.c.bf16 %v126_v4, %v122_v2  ;;  %v121_v18 = vld [vmem:[#allocation2 + $0x110] sm:$0xff]  ;;  %v130_v23 = vld [vmem:[#allocation2 + $0x158] sm:$0xff]  ;;  %v4340_v25 = vpack.c.bf16 %v139_v10, %v135_v9  ;;  %v4343_v26 = vpack.c.bf16 %v148_v16, %v144_v11  ;;  %v143_v28 = vld [vmem:[#allocation2 + $0x1c0] sm:$0xff]  ;;  %v5207_v16 = vmov 0.0|0.0  }
  0x37   :  { %3348 = vmatprep.subr.bf16.mxu0 %v4293_v38  ;;  %v80_v12 = vadd.f32 %v79_v1, %v78_v59  ;;  %v125_v20 = vld [vmem:[#allocation2 + $0x130] sm:$0xff]  ;;  %v134_v24 = vld [vmem:[#allocation2 + $0x178] sm:$0xff]  ;;  %v147_v29 = vld [vmem:[#allocation2 + $0x1e0] sm:$0xff] }
  0x38   :  { %3378 = vmatpush1.bf16.msra.mxu1 %v4334_v15  ;;  %v4346_v32 = vpack.c.bf16 %v125_v20, %v121_v18  ;;  %v4349_v34 = vpack.c.bf16 %v134_v24, %v130_v23  ;;  %v129_v37 = vld [vmem:[#allocation2 + $0x150] sm:$0xff]  ;;  %v4352_v40 = vpack.c.bf16 %v147_v29, %v143_v28  ;;  %v138_v41 = vld [vmem:[#allocation2 + $0x198] sm:$0xff]  ;;  %v4356_v48 = vld [vmem:[#allocation2 + $0x208] sm:$0xff] }
  0x39   :  { %v81_v21 = vrot.slane %v80_v12, 2  ;;  %3380 = vmatprep.subr.bf16.mxu1 %v4337_v17  ;;  %v133_v39 = vld [vmem:[#allocation2 + $0x170] sm:$0xff]  ;;  %v142_v42 = vld [vmem:[#allocation2 + $0x1b8] sm:$0xff]  ;;  %v4365_v58 = vld [vmem:[#allocation2 + $0x200] sm:$0xff] }
  0x3a   :  { %3350 = vmatpush1.bf16.msra.mxu0 %v4314_v51  ;;  %v4359_v49 = vpack.c.bf16 %v133_v39, %v129_v37  ;;  %v4361_v52 = vpack.c.bf16 %v142_v42, %v138_v41  ;;  %v137_v53 = vld [vmem:[#allocation2 + $0x190] sm:$0xff]  ;;  %v146_v56 = vld [vmem:[#allocation2 + $0x1d8] sm:$0xff]  ;;  %v4371_v59 = vld [vmem:[%s5196_s4] sm:$0x1] }
  0x3b   :  { %3352 = vmatprep.subr.bf16.mxu0 %v4319_v55  ;;  %v82_v31 = vadd.f32 %v81_v21, %v80_v12  ;;  %v141_v54 = vld [vmem:[#allocation2 + $0x1b0] sm:$0xff]  ;;  %v150_v57 = vld [vmem:[#allocation2 + $0x1f8] sm:$0xff]  ;;  %v347_v10 = vld [vmem:[%s5198_s6] sm:$0xff] }
  0x3c   :  { %3382 = vmatpush1.bf16.msra.mxu1 %v4346_v32  ;;  %v4374_v61 = vpack.c.bf16 %v141_v54, %v137_v53  ;;  %v4378_v63 = vpack.c.bf16 %v150_v57, %v146_v56  ;;  %v145_v0 = vld [vmem:[#allocation2 + $0x1d0] sm:$0xff]  ;;  %v4386_v4 = vld [vmem:[#allocation2 + $0x218] sm:$0xff]  ;;  %v348_v11 = vld [vmem:[%s5198_s6 + $0x8] sm:$0xff] }
  0x3d   :  { %v83_v35 = vrot.slane %v82_v31, 1  ;;  %3384 = vmatprep.subr.bf16.mxu1 %v4349_v34  ;;  %v149_v1 = vld [vmem:[#allocation2 + $0x1f0] sm:$0xff]  ;;  %v4402_v12 = vpack.c.bf16 %v348_v11, %v347_v10  ;;  %v350_v18 = vld [vmem:[%s5198_s6 + $0x18] sm:$0xff]  ;;  %v351_v21 = vld [vmem:[%s5198_s6 + $0x20] sm:$0xff]  ;;  %v157_v10 = vlaneseq }
  0x3e   :  { %3354 = vmatpush1.bf16.msra.mxu0 %v4328_v5  ;;  %v4383_v2 = vpack.c.bf16 %v149_v1, %v145_v0  ;;  %v4390_v9 = vld [vmem:[#allocation2 + $0x210] sm:$0xff]  ;;  %v352_v23 = vld [vmem:[%s5198_s6 + $0x28] sm:$0xff]  ;;  %v354_v29 = vld [vmem:[%s5198_s6 + $0x38] sm:$0xff]  ;;  %v5205_v1 = vmov 0.0  }
  0x3f   :  { %3356 = vmatprep.subr.bf16.mxu0 %v4331_v6  ;;  %v84_v44 = vadd.f32 %v83_v35, %v82_v31  ;;  %v4423_v24 = vpack.c.bf16 %v352_v23, %v351_v21  ;;  %v353_v28 = vld [vmem:[%s5198_s6 + $0x30] sm:$0xff]  ;;  %v355_v35 = vld [vmem:[%s5198_s6 + $0x40] sm:$0xff]  ;;  %v356_v37 = vld [vmem:[%s5198_s6 + $0x48] sm:$0xff]  ;;  %v4478_v11 = vshrl.u32 %v157_v10, 7 }
  0x40   :  { %3386 = vmatpush1.bf16.msra.mxu1 %v4359_v49  ;;  %v4433_v31 = vpack.c.bf16 %v354_v29, %v353_v28  ;;  %v4443_v39 = vpack.c.bf16 %v356_v37, %v355_v35  ;;  %v357_v41 = vld [vmem:[%s5198_s6 + $0x50] sm:$0xff]  ;;  %v358_v42 = vld [vmem:[%s5198_s6 + $0x58] sm:$0xff]  ;;  %v360_v53 = vld [vmem:[%s5198_s6 + $0x68] sm:$0xff] }
  0x41   :  { %v86_v50 = vmul.f32 0.0625, %v84_v44  ;;  %3388 = vmatprep.subr.bf16.mxu1 %v4361_v52  ;;  %v4453_v44 = vpack.c.bf16 %v358_v42, %v357_v41  ;;  %v361_v56 = vld [vmem:[%s5198_s6 + $0x70] sm:$0xff]  ;;  %v362_v57 = vld [vmem:[%s5198_s6 + $0x78] sm:$0xff]  ;;  %5337 = vst [vmem:[#allocation15_spill] sm:$0xff] %v4478_v11  ;;  %v5209_v21 = vsub.s32 1, %v4478_v11 }
  0x42   :  { %3358 = vmatpush1.bf16.msra.mxu0 %v4340_v25  ;;  %5332 = vst [vmem:[#allocation10_spill] sm:$0xff] %v4433_v31  ;;  %5333 = vst [vmem:[#allocation11_spill] sm:$0xff] %v4443_v39  ;;  %v4472_v0 = vpack.c.bf16 %v362_v57, %v361_v56 }
  0x43   :  { %3360 = vmatprep.subr.bf16.mxu0 %v4343_v26  ;;  %2908 = vmatprep.mubr.msk.f32.mxu0 %vm75_vm0, %v86_v50  ;;  %5334 = vst [vmem:[#allocation12_spill] sm:$0xff] %v4453_v44 }
  0x44   :  { %2909 = vmatprep.mubr.msk.f32.mxu1 %vm75_vm0, %v86_v50  ;;  %3390 = vmatpush1.bf16.msra.mxu1 %v4374_v61  ;;  %v359_v50 = vld [vmem:[%s5198_s6 + $0x60] sm:$0xff]  ;;  %5336 = vst [vmem:[#allocation14_spill] sm:$0xff] %v4472_v0 }
  0x45   :  { %3392 = vmatprep.subr.bf16.mxu1 %v4378_v63  ;;  %v4463_v54 = vpack.c.bf16 %v360_v53, %v359_v50 }
  0x46   :  { %3362 = vmatpush1.bf16.msra.mxu0 %v4352_v40 }
  0x47   :  { %212 = vmatprep.subr.mxu0 %v4356_v48  ;;  %5335 = vst [vmem:[#allocation13_spill] sm:$0xff] %v4463_v54 }
  0x48   :  { %3394 = vmatpush1.bf16.msra.mxu1 %v4383_v2 }
  0x49   :  { %283 = vmatprep.subr.mxu1 %v4386_v4 }
  0x4a   :  { %213 = vmatpush1.msra.mxu0 %v4365_v58 }
  0x4b   :  { %245 = vmatmul.mubr.f32.vlgmr.msra.gmra.mrb[0].mxu0 %v4371_v59  ;;  %3395 = vmatprep.subr.bf16.mxu0 %v5207_v16 }
  0x4c   :  { %284 = vmatpush1.msra.mxu1 %v4390_v9  ;;  %3397 = vmatpush3.bf16.msra.mxu0 %v4402_v12 }
  0x4d   :  { %316 = vmatmul.mubr.f32.vlgmr.msra.gmra.mrb[0].mxu1 %v4371_v59  ;;  %3398 = vmatprep.subr.bf16.mxu0 %v5207_v16 }
  0x4e   :  { %3131 = vmatprep.mubr.msk.f32.mxu1 %vm75_vm0, %v4302_v45  ;;  %v349_v45 = vld [vmem:[%s5198_s6 + $0x10] sm:$0xff]  ;;  %3126 = vmatprep.mubr.msk.f32.mxu0 %vm4172_vm1, %v5205_v1  ;;  %v5216_v1 = vsub.s32 3, %v4478_v11 }
  0x4f   :  { %v4413_v20 = vpack.c.bf16 %v350_v18, %v349_v45  ;;  %v4481_v45 = vsub.s32 0, %v4478_v11  ;;  %v155_v18 = vld [vmem:[%s5195_s3] sm:$0xf] }
  0x50   :  { %v4492_v29 = vrot.slane %v155_v18, %v5209_v21  ;;  %v4500_v21 = vrot.slane %v155_v18, %v5216_v1 }
  0x51   :  { %3400 = vmatpush3.bf16.msra.mxu0 %v4413_v20  ;;  %5338 = vst [vmem:[#allocation16_spill] sm:$0xff] %v4481_v45  ;;  %v4488_v23 = vrot.slane %v155_v18, %v4481_v45 }
  0x52   :  { %3401 = vmatprep.subr.bf16.mxu0 %v5207_v16  ;;  %5340 = vst [vmem:[#allocation18_spill] sm:$0xff] %v4492_v29  ;;  %5341 = vst [vmem:[#allocation19_spill] sm:$0xff] %v4500_v21 }
  0x53   :  { %5339 = vst [vmem:[#allocation17_spill] sm:$0xff] %v4488_v23 }
  0x55   :  { %3403 = vmatpush3.bf16.msra.mxu0 %v4423_v24 }
  0x56   :  { %3404 = vmatprep.subr.bf16.mxu0 %v5207_v16 }
  0x59   :  { %3406 = vmatpush3.bf16.msra.mxu0 %v4433_v31 }
  0x5a   :  { %3407 = vmatprep.subr.bf16.mxu0 %v5207_v16 }
  0x5d   :  { %3409 = vmatpush3.bf16.msra.mxu0 %v4443_v39 }
  0x5e   :  { %3410 = vmatprep.subr.bf16.mxu0 %v5207_v16 }
  0x61   :  { %3412 = vmatpush3.bf16.msra.mxu0 %v4453_v44 }
  0x62   :  { %3413 = vmatprep.subr.bf16.mxu0 %v5207_v16 }
  0x65   :  { %3415 = vmatpush3.bf16.msra.mxu0 %v4463_v54 }
  0x66   :  { %3416 = vmatprep.subr.bf16.mxu0 %v5207_v16  ;;  %v5219_v16 = vsub.s32 2, %v4478_v11  ;;  %v642_v11 = vld [vmem:[#allocation4 + $0x110] sm:$0xff] }
  0x69   :  { %3418 = vmatpush3.bf16.msra.mxu0 %v4472_v0 }
 0x11e   :  { %v246_v28 = vpop.f32.mrb[0].mxu0 }
 0x11f   :  { %v247_v35 = vadd.f32 %v246_v28, %v4488_v23  ;;  %v248_v37 = vpop.f32.mrb[1].mxu0 }
 0x120   :  { %v249_v42 = vadd.f32 %v248_v37, %v4492_v29  ;;  %v317_v53 = vpop.f32.mrb[0].mxu1  ;;  %v4504_v37 = vrot.slane %v155_v18, %v5219_v16  ;;  %v4514_v18 = vld [vmem:[%s5197_s5] sm:$0xff]  ;;  %v613_v16 = vld [vmem:[#allocation4 + $0x28] sm:$0xff] }
 0x121   :  { %v2910_v41 = vmul.f32 -1.442695, %v247_v35  ;;  %v319_v56 = vpop.f32.mrb[1].mxu1  ;;  %5343 = vst [vmem:[#allocation21_spill] sm:$0xff] %v4514_v18 }
 0x122   :  { %v2911_v50 = vmul.f32 -1.442695, %v249_v42  ;;  %5342 = vst [vmem:[#allocation20_spill] sm:$0xff] %v4504_v37 }
 0x123   :  { %4034 = vpow2.f32 %v2910_v41  ;;  %v320_v41 = vadd.f32 %v319_v56, %v4500_v21  ;;  %v644_v21 = vld [vmem:[#allocation4 + $0x120] sm:$0xff] }
 0x124   :  { %4036 = vpow2.f32 %v2911_v50  ;;  %v318_v50 = vadd.f32 %v317_v53, %v4504_v37 }
 0x12d   :  { %v4035_v57 = vpop.eup %4034 }
 0x12e   :  { %v325_v10 = vadd.f32 1.0, %v4035_v57  ;;  %v4037_v28 = vpop.eup %4036 }
 0x12f   :  { %v331_v35 = vadd.f32 1.0, %v4037_v28 }
 0x130   :  { %4038 = vrcp.f32 %v325_v10 }
 0x131   :  { %4040 = vrcp.f32 %v331_v35 }
 0x13a   :  { %v4039_v42 = vpop.eup %4038 }
 0x13b   :  { %v334_v57 = vmul.f32 %v4039_v42, %v320_v41  ;;  %v4041_v29 = vpop.eup %4040 }
 0x13c   :  { %v337_v23 = vsub.f32 1.0, %v4041_v29  ;;  %v339_v1 = vmul.f32 %v4041_v29, %v4371_v59  ;;  %v71_v59 = vld [vmem:[%s5192_s0] sm:$0xff]  ;;  %v614_v29 = vld [vmem:[#allocation4 + $0x30] sm:$0xff] }
 0x13d   :  { %v335_v10 = vadd.f32 %v334_v57, %v318_v50  ;;  %v619_v50 = vld [vmem:[#allocation4 + $0x58] sm:$0xff] }
 0x13e   :  { %v623_v57 = vld [vmem:[#allocation4 + $0x78] sm:$0xff] }
 0x13f   :  { %4042 = vtanh.f32 %v335_v10  ;;  %v618_v10 = vld [vmem:[#allocation4 + $0x50] sm:$0xff] }
 0x149   :  { %v4043_v0 = vpop.eup %4042 }
 0x14a   :  { %v338_v54 = vmul.f32 %v4043_v0, %v337_v23  ;;  %v615_v0 = vld [vmem:[#allocation4 + $0x38] sm:$0xff]  ;;  %v610_v23 = vld [vmem:[#allocation4 + $0x10] sm:$0xff] }
 0x14b   :  { %v4527_v42 = vpack.c.bf16 %v614_v29, %v610_v23  ;;  %v635_v29 = vld [vmem:[#allocation4 + $0xd8] sm:$0xff] }
 0x14c   :  { %v4509_v28 = vadd.f32 %v339_v1, %v338_v54  ;;  %v611_v54 = vld [vmem:[#allocation4 + $0x18] sm:$0xff] }
 0x14d   :  { %v4525_v1 = vpack.c.bf16 %v615_v0, %v611_v54  ;;  %5345 = vst [vmem:[#allocation23_spill] sm:$0xff] %v4527_v42  ;;  %v626_v54 = vld [vmem:[#allocation4 + $0x90] sm:$0xff] }
 0x14e   :  { %v345_v56 = vrot.slane %v4509_v28, %v4481_v45  ;;  %v630_v0 = vld [vmem:[#allocation4 + $0xb0] sm:$0xff] }
 0x14f   :  { %5344 = vst [vmem:[#allocation22_spill] sm:$0xff] %v4525_v1  ;;  %3460 = vmatprep.subr.bf16.mxu0 %v4525_v1  ;;  %v4540_v23 = vpack.c.bf16 %v630_v0, %v626_v54  ;;  %v637_v1 = vld [vmem:[#allocation4 + $0xe8] sm:$0xff]  ;;  %v646_v45 = vld [vmem:[#allocation4 + $0x130] sm:$0xff] }
 0x150   :  { %v346_v53 = vmul.f32 %v345_v56, %v4514_v18  ;;  %v622_v56 = vld [vmem:[#allocation4 + $0x70] sm:$0xff]  ;;  %v636_v18 = vld [vmem:[#allocation4 + $0xe0] sm:$0xff] }
 0x151   :  { %5349 = vst [vmem:[#allocation27_spill] sm:$0xff] %v4540_v23 }
 0x152   :  { %3127 = vmatmul.mubr.f32.vlgmr.msra.gmra.mrb[2].mxu0 %v346_v53  ;;  %v4534_v53 = vpack.c.bf16 %v622_v56, %v618_v10  ;;  %v634_v10 = vld [vmem:[#allocation4 + $0xd0] sm:$0xff] }
 0x153   :  { %3462 = vmatpush1.bf16.msra.mxu0 %v4527_v42  ;;  %v638_v56 = vld [vmem:[#allocation4 + $0xf0] sm:$0xff]  ;;  %v621_v42 = vld [vmem:[#allocation4 + $0x68] sm:$0xff] }
 0x154   :  { %5347 = vst [vmem:[#allocation25_spill] sm:$0xff] %v4534_v53 }
 0x225   :  { %v429_v35 = vpop.f32.mrb[2].mxu0 }
 0x226   :  { %v3128_v41 = vpop.f32.mrb[3].mxu0  ;;  %3129 = vmatprep.subr.mxu1 %v429_v35 }
 0x227   :  { %3130 = vmatpush3.msra.mxu1 %v429_v35  ;;  %v627_v35 = vld [vmem:[#allocation4 + $0x98] sm:$0xff] }
 0x228   :  { %3132 = vmatmul.mubr.msk.f32.vlgmr.msra.gmra.mrb[2].mxu1 %vm75_vm0, %v4309_v47  ;;  %v4530_v47 = vpack.c.bf16 %v623_v57, %v619_v50  ;;  %v631_v41 = vld [vmem:[#allocation4 + $0xb8] sm:$0xff] }
 0x229   :  { %3138 = vmatprep.mubr.msk.f32.mxu1 %vm514_vm2, %v71_v59  ;;  %v4536_v59 = vpack.c.bf16 %v631_v41, %v627_v35  ;;  %v639_v50 = vld [vmem:[#allocation4 + $0xf8] sm:$0xff]  ;;  %v4546_v35 = vpack.c.bf16 %v638_v56, %v634_v10  ;;  %v609_v41 = vld [vmem:[#allocation4 + $0x8] sm:$0xff] }
 0x22a   :  { %5346 = vst [vmem:[#allocation24_spill] sm:$0xff] %v4530_v47  ;;  %3464 = vmatprep.subr.bf16.mxu0 %v4530_v47  ;;  %v4542_v57 = vpack.c.bf16 %v639_v50, %v635_v29  ;;  %v4549_v0 = vpack.c.bf16 %v613_v16, %v609_v41  ;;  %v608_v47 = vld [vmem:[#allocation4] sm:$0xff]  ;;  %v617_v50 = vld [vmem:[#allocation4 + $0x48] sm:$0xff] }
 0x22b   :  { %5348 = vst [vmem:[#allocation26_spill] sm:$0xff] %v4536_v59  ;;  %3466 = vmatpush1.bf16.msra.mxu0 %v4534_v53  ;;  %5351 = vst [vmem:[#allocation29_spill] sm:$0xff] %v4546_v35  ;;  %v612_v29 = vld [vmem:[#allocation4 + $0x20] sm:$0xff]  ;;  %v72_v10 = vld [vmem:[%s5192_s0 + $0x8] sm:$0xff] }
 0x22c   :  { %3468 = vmatprep.subr.bf16.mxu0 %v4536_v59  ;;  %5350 = vst [vmem:[#allocation28_spill] sm:$0xff] %v4542_v57  ;;  %5352 = vst [vmem:[#allocation30_spill] sm:$0xff] %v4549_v0  ;;  %v4554_v56 = vpack.c.bf16 %v612_v29, %v608_v47  ;;  %v625_v16 = vld [vmem:[#allocation4 + $0x88] sm:$0xff]  ;;  %v624_v47 = vld [vmem:[#allocation4 + $0x80] sm:$0xff] }
 0x22d   :  { %v628_v29 = vld [vmem:[#allocation4 + $0xa0] sm:$0xff] }
 0x22e   :  { %5353 = vst [vmem:[#allocation31_spill] sm:$0xff] %v4554_v56 }
 0x22f   :  { %3470 = vmatpush1.bf16.msra.mxu0 %v4540_v23  ;;  %v633_v23 = vld [vmem:[#allocation4 + $0xc8] sm:$0xff] }
 0x230   :  { %3472 = vmatprep.subr.bf16.mxu0 %v4542_v57  ;;  %v616_v57 = vld [vmem:[#allocation4 + $0x40] sm:$0xff] }
 0x233   :  { %3474 = vmatpush1.bf16.msra.mxu0 %v4546_v35  ;;  %v4557_v35 = vpack.c.bf16 %v621_v42, %v617_v50  ;;  %v4567_v42 = vpack.c.bf16 %v628_v29, %v624_v47  ;;  %v4570_v50 = vpack.c.bf16 %v637_v1, %v633_v23  ;;  %v647_v47 = vld [vmem:[#allocation4 + $0x138] sm:$0xff]  ;;  %v640_v29 = vld [vmem:[#allocation4 + $0x100] sm:$0xff] }
 0x234   :  { %v4581_v23 = vpack.c.bf16 %v644_v21, %v640_v29  ;;  %v648_v21 = vld [vmem:[#allocation4 + $0x140] sm:$0xff] }
 0x235   :  { %5354 = vst [vmem:[#allocation32_spill] sm:$0xff] %v4557_v35  ;;  %5357 = vst [vmem:[#allocation35_spill] sm:$0xff] %v4567_v42 }
 0x236   :  { %5358 = vst [vmem:[#allocation36_spill] sm:$0xff] %v4570_v50  ;;  %5362 = vst [vmem:[#allocation40_spill] sm:$0xff] %v4581_v23 }
 0x2fb   :  { %v3133_v53 = vpop.f32.mrb[2].mxu1 }
 0x2fc   :  { %v505_v59 = vpop.f32.mrb[3].mxu1 }
 0x2fd   :  { %v3419_v54 = vpack.c.bf16 %v3133_v53, %v505_v59  ;;  %v620_v53 = vld [vmem:[#allocation4 + $0x60] sm:$0xff]  ;;  %v629_v59 = vld [vmem:[#allocation4 + $0xa8] sm:$0xff] }
 0x2fe   :  { %v4561_v41 = vpack.c.bf16 %v620_v53, %v616_v57  ;;  %v641_v53 = vld [vmem:[#allocation4 + $0x108] sm:$0xff] }
 0x2ff   :  { %3420 = vmatprep.subr.bf16.mxu1 %v3419_v54 }
 0x300   :  { %3422 = vmatpush3.bf16.msra.mxu1 %v3419_v54  ;;  %5355 = vst [vmem:[#allocation33_spill] sm:$0xff] %v4561_v41  ;;  %v4564_v54 = vpack.c.bf16 %v629_v59, %v625_v16  ;;  %v645_v16 = vld [vmem:[#allocation4 + $0x128] sm:$0xff]  ;;  %v643_v59 = vld [vmem:[#allocation4 + $0x118] sm:$0xff] }
 0x301   :  { %3424 = vmatprep.subr.bf16.mxu1 %v4549_v0  ;;  %v4577_v37 = vpack.c.bf16 %v645_v16, %v641_v53  ;;  %v4579_v1 = vpack.c.bf16 %v647_v47, %v643_v59  ;;  %v653_v53 = vld [vmem:[#allocation4 + $0x168] sm:$0xff]  ;;  %v651_v16 = vld [vmem:[#allocation4 + $0x158] sm:$0xff]  ;;  %v652_v47 = vld [vmem:[#allocation4 + $0x160] sm:$0xff] }
 0x302   :  { %5356 = vst [vmem:[#allocation34_spill] sm:$0xff] %v4564_v54  ;;  %v655_v59 = vld [vmem:[#allocation4 + $0x178] sm:$0xff]  ;;  %v4593_v39 = vpack.c.bf16 %v652_v47, %v648_v21  ;;  %v660_v21 = vld [vmem:[#allocation4 + $0x1a0] sm:$0xff] }
 0x303   :  { %3139 = vmatmul.mubr.msk.f32.vlgmr.msra.gmra.mrb[4].mxu1 %vm514_vm2, %v72_v10  ;;  %v632_v10 = vld [vmem:[#allocation4 + $0xc0] sm:$0xff]  ;;  %5360 = vst [vmem:[#allocation38_spill] sm:$0xff] %v4577_v37  ;;  %5361 = vst [vmem:[#allocation39_spill] sm:$0xff] %v4579_v1  ;;  %3476 = vmatprep.subr.bf16.mxu0 %v4579_v1  ;;  %v4591_v29 = vpack.c.bf16 %v655_v59, %v651_v16  ;;  %v663_v16 = vld [vmem:[#allocation4 + $0x1b8] sm:$0xff] }
 0x304   :  { %3426 = vmatpush1.bf16.msra.mxu1 %v4554_v56  ;;  %v4573_v57 = vpack.c.bf16 %v636_v18, %v632_v10  ;;  %v4584_v18 = vpack.c.bf16 %v646_v45, %v642_v11  ;;  %v649_v10 = vld [vmem:[#allocation4 + $0x148] sm:$0xff]  ;;  %5366 = vst [vmem:[#allocation44_spill] sm:$0xff] %v4593_v39  ;;  %v650_v11 = vld [vmem:[#allocation4 + $0x150] sm:$0xff]  ;;  %v656_v59 = vld [vmem:[#allocation4 + $0x180] sm:$0xff] }
 0x305   :  { %3428 = vmatprep.subr.bf16.mxu1 %v4557_v35  ;;  %v4589_v44 = vpack.c.bf16 %v653_v53, %v649_v10  ;;  %5365 = vst [vmem:[#allocation43_spill] sm:$0xff] %v4591_v29  ;;  %v654_v45 = vld [vmem:[#allocation4 + $0x170] sm:$0xff]  ;;  %v661_v10 = vld [vmem:[#allocation4 + $0x1a8] sm:$0xff]  ;;  %v659_v53 = vld [vmem:[#allocation4 + $0x198] sm:$0xff] }
 0x306   :  { %5359 = vst [vmem:[#allocation37_spill] sm:$0xff] %v4573_v57  ;;  %5363 = vst [vmem:[#allocation41_spill] sm:$0xff] %v4584_v18  ;;  %3478 = vmatpush1.bf16.msra.mxu0 %v4584_v18  ;;  %v4596_v1 = vpack.c.bf16 %v654_v45, %v650_v11  ;;  %v657_v18 = vld [vmem:[#allocation4 + $0x188] sm:$0xff]  ;;  %v4603_v47 = vpack.c.bf16 %v663_v16, %v659_v53  ;;  %v658_v11 = vld [vmem:[#allocation4 + $0x190] sm:$0xff] }
 0x307   :  { %5364 = vst [vmem:[#allocation42_spill] sm:$0xff] %v4589_v44  ;;  %3480 = vmatprep.subr.bf16.mxu0 %v4591_v29  ;;  %v662_v45 = vld [vmem:[#allocation4 + $0x1b0] sm:$0xff]  ;;  %v671_v53 = vld [vmem:[#allocation4 + $0x1f8] sm:$0xff]  ;;  %v664_v16 = vld [vmem:[#allocation4 + $0x1c0] sm:$0xff] }
 0x308   :  { %3430 = vmatpush1.bf16.msra.mxu1 %v4561_v41  ;;  %5367 = vst [vmem:[#allocation45_spill] sm:$0xff] %v4596_v1  ;;  %5369 = vst [vmem:[#allocation47_spill] sm:$0xff] %v4603_v47  ;;  %v4608_v29 = vpack.c.bf16 %v662_v45, %v658_v11  ;;  %v666_v11 = vld [vmem:[#allocation4 + $0x1d0] sm:$0xff] }
 0x309   :  { %3432 = vmatprep.subr.bf16.mxu1 %v4564_v54  ;;  %v670_v45 = vld [vmem:[#allocation4 + $0x1f0] sm:$0xff] }
 0x30a   :  { %3482 = vmatpush1.bf16.msra.mxu0 %v4596_v1  ;;  %5371 = vst [vmem:[#allocation49_spill] sm:$0xff] %v4608_v29  ;;  %v665_v1 = vld [vmem:[#allocation4 + $0x1c8] sm:$0xff] }
 0x30b   :  { %3484 = vmatprep.subr.bf16.mxu0 %v4603_v47  ;;  %v4620_v47 = vpack.c.bf16 %v670_v45, %v666_v11  ;;  %v674_v11 = vld [vmem:[#allocation4 + $0x210] sm:$0xff] }
 0x30c   :  { %3434 = vmatpush1.bf16.msra.mxu1 %v4567_v42  ;;  %v678_v45 = vld [vmem:[#allocation4 + $0x230] sm:$0xff] }
 0x30d   :  { %3436 = vmatprep.subr.bf16.mxu1 %v4570_v50  ;;  %5375 = vst [vmem:[#allocation53_spill] sm:$0xff] %v4620_v47 }
 0x30e   :  { %3486 = vmatpush1.bf16.msra.mxu0 %v4608_v29  ;;  %v673_v29 = vld [vmem:[#allocation4 + $0x208] sm:$0xff] }
 0x310   :  { %3438 = vmatpush1.bf16.msra.mxu1 %v4573_v57 }
 0x311   :  { %3440 = vmatprep.subr.bf16.mxu1 %v4577_v37  ;;  %v4605_v37 = vpack.c.bf16 %v660_v21, %v656_v59  ;;  %v668_v59 = vld [vmem:[#allocation4 + $0x1e0] sm:$0xff] }
 0x313   :  { %5370 = vst [vmem:[#allocation48_spill] sm:$0xff] %v4605_v37 }
 0x314   :  { %3442 = vmatpush1.bf16.msra.mxu1 %v4581_v23  ;;  %v4601_v23 = vpack.c.bf16 %v661_v10, %v657_v18  ;;  %v669_v18 = vld [vmem:[#allocation4 + $0x1e8] sm:$0xff]  ;;  %v667_v10 = vld [vmem:[#allocation4 + $0x1d8] sm:$0xff] }
 0x315   :  { %3444 = vmatprep.subr.bf16.mxu1 %v4589_v44  ;;  %v4615_v21 = vpack.c.bf16 %v671_v53, %v667_v10  ;;  %v4617_v44 = vpack.c.bf16 %v668_v59, %v664_v16  ;;  %v679_v10 = vld [vmem:[#allocation4 + $0x238] sm:$0xff]  ;;  %v672_v53 = vld [vmem:[#allocation4 + $0x200] sm:$0xff] }
 0x316   :  { %5368 = vst [vmem:[#allocation46_spill] sm:$0xff] %v4601_v23  ;;  %v676_v16 = vld [vmem:[#allocation4 + $0x220] sm:$0xff] }
 0x317   :  { %5373 = vst [vmem:[#allocation51_spill] sm:$0xff] %v4615_v21  ;;  %5374 = vst [vmem:[#allocation52_spill] sm:$0xff] %v4617_v44  ;;  %3488 = vmatprep.subr.bf16.mxu0 %v4615_v21  ;;  %v4632_v21 = vpack.c.bf16 %v678_v45, %v674_v11 }
 0x318   :  { %3446 = vmatpush1.bf16.msra.mxu1 %v4593_v39  ;;  %v4613_v39 = vpack.c.bf16 %v669_v18, %v665_v1  ;;  %v677_v1 = vld [vmem:[#allocation4 + $0x228] sm:$0xff]  ;;  %v675_v18 = vld [vmem:[#allocation4 + $0x218] sm:$0xff]  ;;  %3490 = vmatpush1.bf16.msra.mxu0 %v4620_v47 }
 0x319   :  { %3448 = vmatprep.subr.bf16.mxu1 %v4601_v23  ;;  %v4627_v59 = vpack.c.bf16 %v679_v10, %v675_v18  ;;  %v4629_v23 = vpack.c.bf16 %v676_v16, %v672_v53  ;;  %5379 = vst [vmem:[#allocation57_spill] sm:$0xff] %v4632_v21 }
 0x31a   :  { %5372 = vst [vmem:[#allocation50_spill] sm:$0xff] %v4613_v39 }
 0x31b   :  { %5377 = vst [vmem:[#allocation55_spill] sm:$0xff] %v4627_v59  ;;  %5378 = vst [vmem:[#allocation56_spill] sm:$0xff] %v4629_v23  ;;  %3492 = vmatprep.subr.bf16.mxu0 %v4627_v59 }
 0x31c   :  { %3450 = vmatpush1.bf16.msra.mxu1 %v4605_v37  ;;  %v4625_v37 = vpack.c.bf16 %v677_v1, %v673_v29  ;;  %3494 = vmatpush1.bf16.msra.mxu0 %v4632_v21  ;;  %v4642_v29 = vld [vmem:[%s5193_s1 + $0x10] sm:$0xff]  ;;  %v4647_v1 = vld [vmem:[%s5193_s1 + $0x18] sm:$0xff] }
 0x31d   :  { %3452 = vmatprep.subr.bf16.mxu1 %v4613_v39  ;;  %3528 = vmatprep.subr.bf16.mxu0 %v4282_v27  ;;  %5380 = vst [vmem:[#allocation58_spill] sm:$0xff] %v4642_v29  ;;  %5381 = vst [vmem:[#allocation59_spill] sm:$0xff] %v4647_v1  ;;  %v872_v18 = vsel %vm75_vm0, %v4642_v29, 0.0  ;;  %v873_v10 = vsel %vm75_vm0, %v4647_v1, 0.0 }
 0x31e   :  { %5376 = vst [vmem:[#allocation54_spill] sm:$0xff] %v4625_v37  ;;  %v874_v53 = vadd.f32 %v873_v10, %v872_v18 }
 0x320   :  { %3454 = vmatpush1.bf16.msra.mxu1 %v4617_v44  ;;  %v875_v16 = vrot.slane %v874_v53, 4 }
 0x321   :  { %3456 = vmatprep.subr.bf16.mxu1 %v4625_v37 }
 0x322   :  { %v876_v21 = vadd.f32 %v875_v16, %v874_v53  ;;  %v5399_v53 = vld [vmem:[#allocation52_spill] sm:$0xff] }
 0x324   :  { %3458 = vmatpush1.bf16.msra.mxu1 %v4629_v23  ;;  %v877_v37 = vrot.slane %v876_v21, 2 }
 0x325   :  { %3496 = vmatprep.subr.bf16.mxu1 %v4263_v3  ;;  %v5400_v16 = vld [vmem:[#allocation54_spill] sm:$0xff] }
 0x326   :  { %v878_v57 = vadd.f32 %v877_v37, %v876_v21  ;;  %v5389_v37 = vld [vmem:[#allocation11_spill] sm:$0xff]  ;;  %v5395_v21 = vld [vmem:[#allocation13_spill] sm:$0xff] }
 0x328   :  { %v879_v50 = vrot.slane %v878_v57, 1 }
 0x32a   :  { %v880_v10 = vadd.f32 %v879_v50, %v878_v57  ;;  %v5391_v50 = vld [vmem:[#allocation42_spill] sm:$0xff]  ;;  %v5392_v57 = vld [vmem:[#allocation12_spill] sm:$0xff] }
 0x3d6   :  { %v3140_v11 = vpop.f32.mrb[4].mxu1 }
 0x3d7   :  { %v597_v45 = vmax.f32 %v3140_v11, 0.0  ;;  %v587_v27 = vpop.f32.mrb[5].mxu1  ;;  %v5401_v11 = vld [vmem:[#allocation56_spill] sm:$0xff] }
 0x3d8   :  { %v596_v59 = vmax.f32 %v587_v27, 0.0  ;;  %v4658_v27 = vld [vmem:[%s5201_s9] sm:$0x1] }
 0x3d9   :  { %v599_v47 = vsel %vm514_vm2, %v597_v45, 0.0  ;;  %v5402_v45 = vld [vmem:[#allocation8_spill] sm:$0xff] }
 0x3da   :  { %v598_v3 = vsel %vm514_vm2, %v596_v59, 0.0  ;;  %v5396_v59 = vld [vmem:[#allocation48_spill] sm:$0xff] }
 0x3db   :  { %v600_v23 = vadd.f32 %v599_v47, %v598_v3  ;;  %v881_v3 = vmul.f32 0.0625, %v880_v10  ;;  %v5394_v47 = vld [vmem:[#allocation46_spill] sm:$0xff]  ;;  %v5403_v10 = vld [vmem:[#allocation16_spill] sm:$0xff] }
 0x3dd   :  { %v601_v44 = vrot.slane %v600_v23, 4 }
 0x3df   :  { %v602_v39 = vadd.f32 %v601_v44, %v600_v23  ;;  %v5388_v44 = vld [vmem:[#allocation38_spill] sm:$0xff]  ;;  %v5393_v23 = vld [vmem:[#allocation44_spill] sm:$0xff] }
 0x3e1   :  { %v603_v29 = vrot.slane %v602_v39, 2 }
 0x3e3   :  { %v604_v31 = vadd.f32 %v603_v29, %v602_v39  ;;  %v5383_v39 = vmov 0.0   ;;  %v5397_v29 = vld [vmem:[#allocation50_spill] sm:$0xff] }
 0x3e5   :  { %v605_v1 = vrot.slane %v604_v31, 1 }
 0x3e7   :  { %v606_v18 = vadd.f32 %v605_v1, %v604_v31  ;;  %v5382_v31 = vmov 0.0|0.0   ;;  %v5398_v1 = vld [vmem:[#allocation14_spill] sm:$0xff] }
 0x3e9   :  { %v607_v42 = vmul.f32 0.0625, %v606_v18  ;;  %v680_v18 = vld [vmem:[%s5200_s8] sm:$0xf] }
 0x3eb   :  { %2916 = vmatprep.mubr.msk.f32.mxu1 %vm514_vm2, %v607_v42  ;;  %2917 = vmatprep.mubr.msk.f32.mxu0 %vm514_vm2, %v607_v42  ;;  %v5390_v42 = vld [vmem:[#allocation40_spill] sm:$0xff] }
 0x3ec   :  { %770 = vmatmul.mubr.f32.vlgmr.msra.gmra.mrb[6].mxu1 %v4658_v27  ;;  %841 = vmatmul.mubr.f32.vlgmr.msra.gmra.mrb[4].mxu0 %v4658_v27 }
 0x3ed   :  { %3498 = vmatpush1.bf16.msra.mxu1 %v4265_v7  ;;  %3530 = vmatpush1.bf16.msra.mxu0 %v4284_v30 }
 0x3ee   :  { %3500 = vmatprep.subr.bf16.mxu1 %v4267_v8  ;;  %3532 = vmatprep.subr.bf16.mxu0 %v4290_v36 }
 0x3ef   :  { %2924 = vmatprep.mubr.msk.f32.mxu1 %vm75_vm0, %v881_v3  ;;  %2925 = vmatprep.mubr.msk.f32.mxu0 %vm75_vm0, %v881_v3  ;;  %v4743_v3 = vrot.slane %v680_v18, %v5403_v10 }
 0x3f1   :  { %3502 = vmatpush1.bf16.msra.mxu1 %v4271_v13  ;;  %3534 = vmatpush1.bf16.msra.mxu0 %v4297_v43 }
 0x3f2   :  { %3504 = vmatprep.subr.bf16.mxu1 %v4274_v14  ;;  %3536 = vmatprep.subr.bf16.mxu0 %v4304_v46 }
 0x3f5   :  { %3506 = vmatpush1.bf16.msra.mxu1 %v4277_v19  ;;  %3538 = vmatpush1.bf16.msra.mxu0 %v4322_v60 }
 0x3f6   :  { %3508 = vmatprep.subr.bf16.mxu1 %v4280_v22  ;;  %3540 = vmatprep.subr.bf16.mxu0 %v4325_v62 }
 0x3f9   :  { %3510 = vmatpush1.bf16.msra.mxu1 %v4287_v33  ;;  %3542 = vmatpush1.bf16.msra.mxu0 %v4334_v15 }
 0x3fa   :  { %3512 = vmatprep.subr.bf16.mxu1 %v4293_v38  ;;  %3544 = vmatprep.subr.bf16.mxu0 %v4337_v17 }
 0x3fd   :  { %3514 = vmatpush1.bf16.msra.mxu1 %v4314_v51  ;;  %3546 = vmatpush1.bf16.msra.mxu0 %v4346_v32 }
 0x3fe   :  { %3516 = vmatprep.subr.bf16.mxu1 %v4319_v55  ;;  %3548 = vmatprep.subr.bf16.mxu0 %v4349_v34 }
 0x401   :  { %3518 = vmatpush1.bf16.msra.mxu1 %v4328_v5  ;;  %3550 = vmatpush1.bf16.msra.mxu0 %v4359_v49 }
 0x402   :  { %3520 = vmatprep.subr.bf16.mxu1 %v4331_v6  ;;  %3552 = vmatprep.subr.bf16.mxu0 %v4361_v52 }
 0x405   :  { %3522 = vmatpush1.bf16.msra.mxu1 %v4340_v25  ;;  %3554 = vmatpush1.bf16.msra.mxu0 %v4374_v61 }
 0x406   :  { %3524 = vmatprep.subr.bf16.mxu1 %v4343_v26  ;;  %3556 = vmatprep.subr.bf16.mxu0 %v4378_v63 }
 0x409   :  { %3526 = vmatpush1.bf16.msra.mxu1 %v4352_v40  ;;  %3558 = vmatpush1.bf16.msra.mxu0 %v4383_v2 }
 0x40a   :  { %917 = vmatprep.subr.mxu1 %v4356_v48  ;;  %988 = vmatprep.subr.mxu0 %v4386_v4  ;;  %v5384_v48 = vld [vmem:[#allocation35_spill] sm:$0xff]  ;;  %v5386_v4 = vld [vmem:[#allocation10_spill] sm:$0xff] }
 0x40b   :  { %5404 = vst [vmem:[#allocation10_spill] sm:$0xff] %v4743_v3 }
 0x40d   :  { %918 = vmatpush1.msra.mxu1 %v4365_v58  ;;  %989 = vmatpush1.msra.mxu0 %v4390_v9  ;;  %v5385_v58 = vld [vmem:[#allocation36_spill] sm:$0xff]  ;;  %v5387_v9 = vld [vmem:[#allocation37_spill] sm:$0xff] }
 0x40e   :  { %950 = vmatmul.mubr.f32.vlgmr.msra.gmra.mrb[8].mxu1 %v4509_v28  ;;  %1021 = vmatmul.mubr.f32.vlgmr.msra.gmra.mrb[6].mxu0 %v4509_v28 }
 0x40f   :  { %3559 = vmatprep.subr.bf16.mxu1 %v5382_v31  ;;  %3173 = vmatprep.mubr.msk.f32.mxu1 %vm4172_vm1, %v5383_v39 }
 0x410   :  { %3561 = vmatpush3.bf16.msra.mxu1 %v4402_v12  ;;  %3588 = vmatprep.subr.bf16.mxu0 %v4549_v0 }
 0x411   :  { %3562 = vmatprep.subr.bf16.mxu1 %v5382_v31  ;;  %3590 = vmatpush1.bf16.msra.mxu0 %v4554_v56 }
 0x412   :  { %3592 = vmatprep.subr.bf16.mxu0 %v4557_v35 }
 0x414   :  { %3564 = vmatpush3.bf16.msra.mxu1 %v4413_v20 }
 0x415   :  { %3565 = vmatprep.subr.bf16.mxu1 %v5382_v31  ;;  %3594 = vmatpush1.bf16.msra.mxu0 %v4561_v41 }
 0x416   :  { %3596 = vmatprep.subr.bf16.mxu0 %v4564_v54 }
 0x418   :  { %3567 = vmatpush3.bf16.msra.mxu1 %v4423_v24 }
 0x419   :  { %3568 = vmatprep.subr.bf16.mxu1 %v5382_v31  ;;  %3598 = vmatpush1.bf16.msra.mxu0 %v5384_v48 }
 0x41a   :  { %3600 = vmatprep.subr.bf16.mxu0 %v5385_v58 }
 0x41c   :  { %3570 = vmatpush3.bf16.msra.mxu1 %v5386_v4 }
 0x41d   :  { %3571 = vmatprep.subr.bf16.mxu1 %v5382_v31  ;;  %3602 = vmatpush1.bf16.msra.mxu0 %v5387_v9 }
 0x41e   :  { %3604 = vmatprep.subr.bf16.mxu0 %v5388_v44 }
 0x420   :  { %3573 = vmatpush3.bf16.msra.mxu1 %v5389_v37 }
 0x421   :  { %3574 = vmatprep.subr.bf16.mxu1 %v5382_v31  ;;  %3606 = vmatpush1.bf16.msra.mxu0 %v5390_v42 }
 0x422   :  { %3608 = vmatprep.subr.bf16.mxu0 %v5391_v50 }
 0x424   :  { %3576 = vmatpush3.bf16.msra.mxu1 %v5392_v57 }
 0x425   :  { %3577 = vmatprep.subr.bf16.mxu1 %v5382_v31  ;;  %3610 = vmatpush1.bf16.msra.mxu0 %v5393_v23 }
 0x426   :  { %3612 = vmatprep.subr.bf16.mxu0 %v5394_v47  ;;  %v5405_v47 = vld [vmem:[#allocation15_spill] sm:$0xff] }
 0x427   :  { %v5408_v48 = vsub.s32 3, %v5405_v47  ;;  %v5410_v35 = vsub.s32 2, %v5405_v47 }
 0x428   :  { %3579 = vmatpush3.bf16.msra.mxu1 %v5395_v21 }
 0x429   :  { %3580 = vmatprep.subr.bf16.mxu1 %v5382_v31  ;;  %3614 = vmatpush1.bf16.msra.mxu0 %v5396_v59  ;;  %v4753_v54 = vrot.slane %v680_v18, %v5408_v48 }
 0x42a   :  { %3616 = vmatprep.subr.bf16.mxu0 %v5397_v29  ;;  %v5406_v29 = vsub.s32 1, %v5405_v47 }
 0x42b   :  { %5409 = vst [vmem:[#allocation60_spill] sm:$0xff] %v4753_v54 }
 0x42c   :  { %3582 = vmatpush3.bf16.msra.mxu1 %v5398_v1  ;;  %v4747_v23 = vrot.slane %v680_v18, %v5406_v29 }
 0x42d   :  { %3618 = vmatpush1.bf16.msra.mxu0 %v5399_v53 }
 0x42e   :  { %3620 = vmatprep.subr.bf16.mxu0 %v5400_v16  ;;  %5407 = vst [vmem:[#allocation15_spill] sm:$0xff] %v4747_v23 }
 0x431   :  { %3622 = vmatpush1.bf16.msra.mxu0 %v5401_v11 }
 0x432   :  { %3660 = vmatprep.subr.bf16.mxu0 %v5402_v45 }
 0x4bf   :  { %v771_v59 = vpop.f32.mrb[6].mxu1  ;;  %v842_v50 = vpop.f32.mrb[4].mxu0 }
 0x4c0   :  { %v772_v53 = vadd.f32 %v771_v59, %v4743_v3  ;;  %v773_v16 = vpop.f32.mrb[7].mxu1  ;;  %v844_v42 = vpop.f32.mrb[5].mxu0  ;;  %v4757_v59 = vrot.slane %v680_v18, %v5410_v35  ;;  %v5413_v3 = vld [vmem:[#allocation18_spill] sm:$0xff] }
 0x4c1   :  { %v774_v45 = vadd.f32 %v773_v16, %v4747_v23 }
 0x4c2   :  { %v2918_v11 = vmul.f32 -1.442695, %v772_v53  ;;  %5411 = vst [vmem:[#allocation61_spill] sm:$0xff] %v4757_v59  ;;  %v845_v53 = vadd.f32 %v844_v42, %v4753_v54  ;;  %v843_v16 = vadd.f32 %v842_v50, %v4757_v59 }
 0x4c3   :  { %v2919_v44 = vmul.f32 -1.442695, %v774_v45  ;;  %v5412_v45 = vld [vmem:[#allocation17_spill] sm:$0xff] }
 0x4c4   :  { %4044 = vpow2.f32 %v2918_v11 }
 0x4c5   :  { %4046 = vpow2.f32 %v2919_v44 }
 0x4ce   :  { %v4045_v9 = vpop.eup %4044 }
 0x4cf   :  { %v850_v58 = vadd.f32 1.0, %v4045_v9  ;;  %v4047_v29 = vpop.eup %4046 }
 0x4d0   :  { %v856_v41 = vadd.f32 1.0, %v4047_v29 }
 0x4d1   :  { %4048 = vrcp.f32 %v850_v58 }
 0x4d2   :  { %4050 = vrcp.f32 %v856_v41 }
 0x4db   :  { %v4049_v56 = vpop.eup %4048 }
 0x4dc   :  { %v859_v44 = vmul.f32 %v4049_v56, %v845_v53  ;;  %v4051_v35 = vpop.eup %4050 }
 0x4dd   :  { %v862_v42 = vsub.f32 1.0, %v4051_v35  ;;  %v864_v50 = vmul.f32 %v4051_v35, %v4658_v27 }
 0x4de   :  { %v860_v11 = vadd.f32 %v859_v44, %v843_v16 }
 0x4e0   :  { %4052 = vtanh.f32 %v860_v11 }
 0x4e1   :  { %v951_v58 = vpop.f32.mrb[8].mxu1  ;;  %v1022_v9 = vpop.f32.mrb[6].mxu0 }
 0x4e2   :  { %v952_v48 = vadd.f32 %v951_v58, %v5412_v45  ;;  %v953_v0 = vpop.f32.mrb[9].mxu1  ;;  %v1024_v23 = vpop.f32.mrb[7].mxu0  ;;  %v5414_v58 = vld [vmem:[#allocation19_spill] sm:$0xff] }
 0x4e3   :  { %v954_v47 = vadd.f32 %v953_v0, %v5413_v3  ;;  %v5415_v0 = vld [vmem:[#allocation20_spill] sm:$0xff] }
 0x4e4   :  { %v2926_v29 = vmul.f32 -1.442695, %v952_v48  ;;  %v1025_v48 = vadd.f32 %v1024_v23, %v5414_v58  ;;  %v1023_v3 = vadd.f32 %v1022_v9, %v5415_v0 }
 0x4e5   :  { %v2927_v18 = vmul.f32 -1.442695, %v954_v47 }
 0x4e6   :  { %4054 = vpow2.f32 %v2926_v29 }
 0x4e7   :  { %4056 = vpow2.f32 %v2927_v18 }
 0x4ea   :  { %v4053_v54 = vpop.eup %4052 }
 0x4eb   :  { %v863_v41 = vmul.f32 %v4053_v54, %v862_v42 }
 0x4ed   :  { %v4764_v56 = vadd.f32 %v864_v50, %v863_v41 }
 0x4f0   :  { %v4055_v53 = vpop.eup %4054 }
 0x4f1   :  { %v1030_v16 = vadd.f32 1.0, %v4055_v53  ;;  %v4057_v44 = vpop.eup %4056  ;;  %v5416_v53 = vld [vmem:[#allocation21_spill] sm:$0xff] }
 0x4f2   :  { %v1036_v11 = vadd.f32 1.0, %v4057_v44 }
 0x4f3   :  { %4058 = vrcp.f32 %v1030_v16  ;;  %v5417_v16 = vld [vmem:[#allocation58_spill] sm:$0xff] }
 0x4f4   :  { %4060 = vrcp.f32 %v1036_v11 }
 0x4fd   :  { %v4059_v45 = vpop.eup %4058 }
 0x4fe   :  { %v1039_v29 = vmul.f32 %v4059_v45, %v1025_v48  ;;  %v4061_v54 = vpop.eup %4060  ;;  %v5418_v45 = vld [vmem:[#allocation59_spill] sm:$0xff] }
 0x4ff   :  { %v1042_v42 = vsub.f32 1.0, %v4061_v54  ;;  %v1044_v35 = vmul.f32 %v4061_v54, %v4509_v28  ;;  %v2920_v28 = vld [vmem:[%s5192_s0 + $0x10] sm:$0xff]  ;;  %v5420_v54 = vld [vmem:[#allocation23_spill] sm:$0xff] }
 0x500   :  { %v1040_v47 = vadd.f32 %v1039_v29, %v1023_v3  ;;  %v2921_v29 = vld [vmem:[%s5192_s0 + $0x18] sm:$0xff] }
 0x502   :  { %4062 = vtanh.f32 %v1040_v47  ;;  %v5419_v47 = vld [vmem:[#allocation22_spill] sm:$0xff] }
 0x50c   :  { %v4063_v27 = vpop.eup %4062 }
 0x50d   :  { %v1043_v18 = vmul.f32 %v4063_v27, %v1042_v42  ;;  %v5421_v42 = vld [vmem:[#allocation24_spill] sm:$0xff]  ;;  %v5422_v27 = vld [vmem:[#allocation25_spill] sm:$0xff] }
 0x50f   :  { %v4769_v41 = vadd.f32 %v1044_v35, %v1043_v18  ;;  %v5423_v35 = vld [vmem:[#allocation26_spill] sm:$0xff]  ;;  %v5424_v18 = vld [vmem:[#allocation27_spill] sm:$0xff] }
 0x511   :  { %v1049_v50 = vrot.slane %v4769_v41, %v5403_v10 }
 0x513   :  { %v1050_v23 = vmul.f32 %v1049_v50, %v5416_v53  ;;  %v5425_v50 = vld [vmem:[#allocation28_spill] sm:$0xff]  ;;  %v5426_v53 = vld [vmem:[#allocation29_spill] sm:$0xff] }
 0x515   :  { %3174 = vmatmul.mubr.f32.vlgmr.msra.gmra.mrb[10].mxu1 %v1050_v23  ;;  %v5427_v23 = vld [vmem:[#allocation39_spill] sm:$0xff] }
 0x516   :  { %3178 = vmatprep.mubr.msk.f32.mxu1 %vm75_vm0, %v5417_v16  ;;  %v5428_v16 = vld [vmem:[#allocation41_spill] sm:$0xff] }
 0x5e8   :  { %v1117_v9 = vpop.f32.mrb[10].mxu1 }
 0x5e9   :  { %v3175_v3 = vpop.f32.mrb[11].mxu1  ;;  %3176 = vmatprep.subr.mxu1 %v1117_v9 }
 0x5ea   :  { %3177 = vmatpush3.msra.mxu1 %v1117_v9  ;;  %v5429_v9 = vld [vmem:[#allocation43_spill] sm:$0xff]  ;;  %v5430_v3 = vld [vmem:[#allocation45_spill] sm:$0xff] }
 0x5eb   :  { %3179 = vmatmul.mubr.msk.f32.vlgmr.msra.gmra.mrb[12].mxu1 %vm75_vm0, %v5418_v45  ;;  %v5431_v45 = vld [vmem:[#allocation47_spill] sm:$0xff] }
 0x5ec   :  { %3185 = vmatprep.mubr.msk.f32.mxu1 %vm514_vm2, %v2920_v28  ;;  %v5432_v28 = vld [vmem:[#allocation49_spill] sm:$0xff] }
 0x6be   :  { %v3180_v44 = vpop.f32.mrb[12].mxu1 }
 0x6bf   :  { %v1193_v11 = vpop.f32.mrb[13].mxu1 }
 0x6c0   :  { %v3583_v48 = vpack.c.bf16 %v3180_v44, %v1193_v11  ;;  %v5433_v44 = vld [vmem:[#allocation51_spill] sm:$0xff]  ;;  %v5434_v11 = vld [vmem:[#allocation53_spill] sm:$0xff] }
 0x6c2   :  { %3584 = vmatprep.subr.bf16.mxu1 %v3583_v48 }
 0x6c3   :  { %3586 = vmatpush3.bf16.msra.mxu1 %v3583_v48  ;;  %v5435_v48 = vld [vmem:[#allocation55_spill] sm:$0xff] }
 0x6c4   :  { %3624 = vmatprep.subr.bf16.mxu1 %v5419_v47 }
 0x6c6   :  { %3186 = vmatmul.mubr.msk.f32.vlgmr.msra.gmra.mrb[14].mxu1 %vm514_vm2, %v2921_v29  ;;  %v5436_v29 = vld [vmem:[#allocation57_spill] sm:$0xff] }
 0x6c7   :  { %3626 = vmatpush1.bf16.msra.mxu1 %v5420_v54 }
 0x6c8   :  { %3628 = vmatprep.subr.bf16.mxu1 %v5421_v42 }
 0x6cb   :  { %3630 = vmatpush1.bf16.msra.mxu1 %v5422_v27 }
 0x6cc   :  { %3632 = vmatprep.subr.bf16.mxu1 %v5423_v35 }
 0x6cf   :  { %3634 = vmatpush1.bf16.msra.mxu1 %v5424_v18 }
 0x6d0   :  { %3636 = vmatprep.subr.bf16.mxu1 %v5425_v50 }
 0x6d3   :  { %3638 = vmatpush1.bf16.msra.mxu1 %v5426_v53  ;;  %v5437_v53 = vld [vmem:[#allocation9_spill] sm:$0xff] }
 0x6d4   :  { %3640 = vmatprep.subr.bf16.mxu1 %v5427_v23 }
 0x6d7   :  { %3642 = vmatpush1.bf16.msra.mxu1 %v5428_v16 }
 0x6d8   :  { %3644 = vmatprep.subr.bf16.mxu1 %v5429_v9  ;;  %v4808_v9 = vld [vmem:[%s5193_s1 + $0x20] sm:$0xff] }
 0x6db   :  { %3646 = vmatpush1.bf16.msra.mxu1 %v5430_v3 }
 0x6dc   :  { %3648 = vmatprep.subr.bf16.mxu1 %v5431_v45  ;;  %v4813_v45 = vld [vmem:[%s5193_s1 + $0x28] sm:$0xff] }
 0x6dd   :  { %5438 = vst [vmem:[#allocation21_spill] sm:$0xff] %v4813_v45 }
 0x6df   :  { %3650 = vmatpush1.bf16.msra.mxu1 %v5432_v28 }
 0x6e0   :  { %3652 = vmatprep.subr.bf16.mxu1 %v5433_v44  ;;  %v1465_v44 = vsel %vm75_vm0, %v4808_v9, 0.0 }
 0x6e3   :  { %3654 = vmatpush1.bf16.msra.mxu1 %v5434_v11 }
 0x6e4   :  { %3656 = vmatprep.subr.bf16.mxu1 %v5435_v48  ;;  %v1466_v48 = vsel %vm75_vm0, %v4813_v45, 0.0 }
 0x6e5   :  { %v1467_v11 = vadd.f32 %v1466_v48, %v1465_v44 }
 0x6e7   :  { %3658 = vmatpush1.bf16.msra.mxu1 %v5436_v29  ;;  %v1468_v29 = vrot.slane %v1467_v11, 4 }
 0x6e8   :  { %3692 = vmatprep.subr.bf16.mxu1 %v5437_v53 }
 0x6e9   :  { %v1469_v16 = vadd.f32 %v1468_v29, %v1467_v11 }
 0x6eb   :  { %v1470_v27 = vrot.slane %v1469_v16, 2 }
 0x6ed   :  { %v1471_v10 = vadd.f32 %v1470_v27, %v1469_v16  ;;  %v5440_v27 = vld [vmem:[#allocation10_spill] sm:$0xff] }
 0x6ef   :  { %v1472_v59 = vrot.slane %v1471_v10, 1 }
 0x6f1   :  { %v1473_v48 = vadd.f32 %v1472_v59, %v1471_v10  ;;  %v4857_v10 = vld [vmem:[#allocation2 + $0x208] sm:$0xff]  ;;  %v4860_v59 = vld [vmem:[#allocation2 + $0x218] sm:$0xff] }
 0x799   :  { %v3187_v28 = vpop.f32.mrb[14].mxu1 }
 0x79a   :  { %v1284_v53 = vmax.f32 %v3187_v28, 0.0  ;;  %v1274_v3 = vpop.f32.mrb[15].mxu1 }
 0x79b   :  { %v1283_v23 = vmax.f32 %v1274_v3, 0.0  ;;  %v1474_v3 = vmul.f32 0.0625, %v1473_v48 }
 0x79c   :  { %v1286_v50 = vsel %vm514_vm2, %v1284_v53, 0.0 }
 0x79d   :  { %v1285_v18 = vsel %vm514_vm2, %v1283_v23, 0.0  ;;  %v5441_v23 = vld [vmem:[#allocation15_spill] sm:$0xff] }
 0x79e   :  { %v1287_v35 = vadd.f32 %v1286_v50, %v1285_v18 }
 0x7a0   :  { %v1288_v42 = vrot.slane %v1287_v35, 4 }
 0x7a2   :  { %v1289_v54 = vadd.f32 %v1288_v42, %v1287_v35 }
 0x7a4   :  { %v1290_v0 = vrot.slane %v1289_v54, 2 }
 0x7a6   :  { %v1291_v58 = vadd.f32 %v1290_v0, %v1289_v54  ;;  %v4866_v0 = vld [vmem:[#allocation2 + $0x210] sm:$0xff] }
 0x7a8   :  { %v1292_v45 = vrot.slane %v1291_v58, 1 }
 0x7aa   :  { %v1293_v44 = vadd.f32 %v1292_v45, %v1291_v58  ;;  %v4863_v58 = vld [vmem:[#allocation2 + $0x200] sm:$0xff] }
 0x7ac   :  { %v1294_v47 = vmul.f32 0.0625, %v1293_v44  ;;  %v5442_v44 = vld [vmem:[#allocation60_spill] sm:$0xff] }
 0x7ae   :  { %2932 = vmatprep.mubr.msk.f32.mxu0 %vm514_vm2, %v1294_v47  ;;  %2933 = vmatprep.mubr.msk.f32.mxu1 %vm514_vm2, %v1294_v47  ;;  %v5439_v47 = vld [vmem:[#allocation22_spill] sm:$0xff] }
 0x7af   :  { %1363 = vmatmul.mubr.f32.vlgmr.msra.gmra.mrb[8].mxu0 %v4764_v56  ;;  %1434 = vmatmul.mubr.f32.vlgmr.msra.gmra.mrb[16].mxu1 %v4764_v56 }
 0x7b0   :  { %3662 = vmatpush1.bf16.msra.mxu0 %v4265_v7  ;;  %3694 = vmatpush1.bf16.msra.mxu1 %v4284_v30 }
 0x7b1   :  { %3664 = vmatprep.subr.bf16.mxu0 %v4267_v8  ;;  %3696 = vmatprep.subr.bf16.mxu1 %v4290_v36 }
 0x7b2   :  { %2940 = vmatprep.mubr.msk.f32.mxu0 %vm75_vm0, %v1474_v3  ;;  %2941 = vmatprep.mubr.msk.f32.mxu1 %vm75_vm0, %v1474_v3 }
 0x7b4   :  { %3666 = vmatpush1.bf16.msra.mxu0 %v4271_v13  ;;  %3698 = vmatpush1.bf16.msra.mxu1 %v4297_v43 }
 0x7b5   :  { %3668 = vmatprep.subr.bf16.mxu0 %v4274_v14  ;;  %3700 = vmatprep.subr.bf16.mxu1 %v4304_v46 }
 0x7b8   :  { %3670 = vmatpush1.bf16.msra.mxu0 %v4277_v19  ;;  %3702 = vmatpush1.bf16.msra.mxu1 %v4322_v60 }
 0x7b9   :  { %3672 = vmatprep.subr.bf16.mxu0 %v4280_v22  ;;  %3704 = vmatprep.subr.bf16.mxu1 %v4325_v62 }
 0x7bc   :  { %3674 = vmatpush1.bf16.msra.mxu0 %v4287_v33  ;;  %3706 = vmatpush1.bf16.msra.mxu1 %v4334_v15 }
 0x7bd   :  { %3676 = vmatprep.subr.bf16.mxu0 %v4293_v38  ;;  %3708 = vmatprep.subr.bf16.mxu1 %v4337_v17 }
 0x7c0   :  { %3678 = vmatpush1.bf16.msra.mxu0 %v4314_v51  ;;  %3710 = vmatpush1.bf16.msra.mxu1 %v4346_v32 }
 0x7c1   :  { %3680 = vmatprep.subr.bf16.mxu0 %v4319_v55  ;;  %3712 = vmatprep.subr.bf16.mxu1 %v4349_v34 }
 0x7c4   :  { %3682 = vmatpush1.bf16.msra.mxu0 %v4328_v5  ;;  %3714 = vmatpush1.bf16.msra.mxu1 %v4359_v49 }
 0x7c5   :  { %3684 = vmatprep.subr.bf16.mxu0 %v4331_v6  ;;  %3716 = vmatprep.subr.bf16.mxu1 %v4361_v52 }
 0x7c8   :  { %3686 = vmatpush1.bf16.msra.mxu0 %v4340_v25  ;;  %3718 = vmatpush1.bf16.msra.mxu1 %v4374_v61 }
 0x7c9   :  { %3688 = vmatprep.subr.bf16.mxu0 %v4343_v26  ;;  %3720 = vmatprep.subr.bf16.mxu1 %v4378_v63 }
 0x7cc   :  { %3690 = vmatpush1.bf16.msra.mxu0 %v4352_v40  ;;  %3722 = vmatpush1.bf16.msra.mxu1 %v4383_v2 }
 0x7cd   :  { %1510 = vmatprep.subr.mxu0 %v4857_v10  ;;  %1581 = vmatprep.subr.mxu1 %v4860_v59 }
 0x7d0   :  { %1511 = vmatpush1.msra.mxu0 %v4863_v58  ;;  %1582 = vmatpush1.msra.mxu1 %v4866_v0 }
 0x7d1   :  { %1543 = vmatmul.mubr.f32.vlgmr.msra.gmra.mrb[10].mxu0 %v4769_v41  ;;  %1614 = vmatmul.mubr.f32.vlgmr.msra.gmra.mrb[18].mxu1 %v4769_v41 }
 0x7d2   :  { %3723 = vmatprep.subr.bf16.mxu0 %v5382_v31  ;;  %3220 = vmatprep.mubr.msk.f32.mxu0 %vm4172_vm1, %v5383_v39 }
 0x7d3   :  { %3725 = vmatpush3.bf16.msra.mxu0 %v4402_v12  ;;  %3225 = vmatprep.mubr.msk.f32.mxu1 %vm75_vm0, %v4808_v9 }
 0x7d4   :  { %3726 = vmatprep.subr.bf16.mxu0 %v5382_v31 }
 0x7d7   :  { %3728 = vmatpush3.bf16.msra.mxu0 %v4413_v20 }
 0x7d8   :  { %3729 = vmatprep.subr.bf16.mxu0 %v5382_v31 }
 0x7db   :  { %3731 = vmatpush3.bf16.msra.mxu0 %v4423_v24 }
 0x7dc   :  { %3732 = vmatprep.subr.bf16.mxu0 %v5382_v31 }
 0x7df   :  { %3734 = vmatpush3.bf16.msra.mxu0 %v5386_v4 }
 0x7e0   :  { %3735 = vmatprep.subr.bf16.mxu0 %v5382_v31 }
 0x7e3   :  { %3737 = vmatpush3.bf16.msra.mxu0 %v5389_v37 }
 0x7e4   :  { %3738 = vmatprep.subr.bf16.mxu0 %v5382_v31 }
 0x7e7   :  { %3740 = vmatpush3.bf16.msra.mxu0 %v5392_v57 }
 0x7e8   :  { %3741 = vmatprep.subr.bf16.mxu0 %v5382_v31 }
 0x7eb   :  { %3743 = vmatpush3.bf16.msra.mxu0 %v5395_v21 }
 0x7ec   :  { %3744 = vmatprep.subr.bf16.mxu0 %v5382_v31 }
 0x7ef   :  { %3746 = vmatpush3.bf16.msra.mxu0 %v5398_v1 }
 0x7f0   :  { %3788 = vmatprep.subr.bf16.mxu0 %v5439_v47  ;;  %v5443_v47 = vld [vmem:[#allocation61_spill] sm:$0xff] }
 0x882   :  { %v1364_v54 = vpop.f32.mrb[8].mxu0  ;;  %v1435_v42 = vpop.f32.mrb[16].mxu1 }
 0x883   :  { %v1365_v35 = vadd.f32 %v1364_v54, %v5440_v27  ;;  %v1366_v18 = vpop.f32.mrb[9].mxu0  ;;  %v1437_v50 = vpop.f32.mrb[17].mxu1  ;;  %v1436_v1 = vadd.f32 %v1435_v42, %v5443_v47 }
 0x884   :  { %v1367_v16 = vadd.f32 %v1366_v18, %v5441_v23  ;;  %v1438_v48 = vadd.f32 %v1437_v50, %v5442_v44  ;;  %v5444_v18 = vld [vmem:[#allocation17_spill] sm:$0xff] }
 0x885   :  { %v2934_v53 = vmul.f32 -1.442695, %v1365_v35 }
 0x886   :  { %v2935_v9 = vmul.f32 -1.442695, %v1367_v16 }
 0x887   :  { %4064 = vpow2.f32 %v2934_v53 }
 0x888   :  { %4066 = vpow2.f32 %v2935_v9 }
 0x891   :  { %v4065_v45 = vpop.eup %4064 }
 0x892   :  { %v1443_v28 = vadd.f32 1.0, %v4065_v45  ;;  %v4067_v11 = vpop.eup %4066  ;;  %v5445_v45 = vld [vmem:[#allocation18_spill] sm:$0xff] }
 0x893   :  { %v1449_v29 = vadd.f32 1.0, %v4067_v11 }
 0x894   :  { %4068 = vrcp.f32 %v1443_v28 }
 0x895   :  { %4070 = vrcp.f32 %v1449_v29 }
 0x89e   :  { %v4069_v3 = vpop.eup %4068 }
 0x89f   :  { %v1452_v54 = vmul.f32 %v4069_v3, %v1438_v48  ;;  %v4071_v57 = vpop.eup %4070 }
 0x8a0   :  { %v1455_v50 = vsub.f32 1.0, %v4071_v57  ;;  %v1457_v42 = vmul.f32 %v4071_v57, %v4764_v56 }
 0x8a1   :  { %v1453_v27 = vadd.f32 %v1452_v54, %v1436_v1  ;;  %v5446_v54 = vld [vmem:[#allocation19_spill] sm:$0xff] }
 0x8a3   :  { %4072 = vtanh.f32 %v1453_v27 }
 0x8a4   :  { %v1544_v35 = vpop.f32.mrb[10].mxu0  ;;  %v1615_v21 = vpop.f32.mrb[18].mxu1 }
 0x8a5   :  { %v1545_v53 = vadd.f32 %v1544_v35, %v5444_v18  ;;  %v1546_v16 = vpop.f32.mrb[11].mxu0  ;;  %v1617_v9 = vpop.f32.mrb[19].mxu1 }
 0x8a6   :  { %v1547_v28 = vadd.f32 %v1546_v16, %v5445_v45  ;;  %v1618_v35 = vadd.f32 %v1617_v9, %v5446_v54  ;;  %v5447_v16 = vld [vmem:[#allocation20_spill] sm:$0xff] }
 0x8a7   :  { %v2942_v23 = vmul.f32 -1.442695, %v1545_v53  ;;  %v1616_v45 = vadd.f32 %v1615_v21, %v5447_v16  ;;  %v4911_v9 = vld [vmem:[%s5197_s5] sm:$0xff] }
 0x8a8   :  { %v2943_v11 = vmul.f32 -1.442695, %v1547_v28  ;;  %5449 = vst [vmem:[#allocation58_spill] sm:$0xff] %v4911_v9 }
 0x8a9   :  { %4074 = vpow2.f32 %v2942_v23 }
 0x8aa   :  { %4076 = vpow2.f32 %v2943_v11 }
 0x8ad   :  { %v4073_v44 = vpop.eup %4072 }
 0x8ae   :  { %v1456_v37 = vmul.f32 %v4073_v44, %v1455_v50 }
 0x8b0   :  { %v4899_v1 = vadd.f32 %v1457_v42, %v1456_v37  ;;  %v5448_v42 = vld [vmem:[#allocation16_spill] sm:$0xff] }
 0x8b3   :  { %v4075_v27 = vpop.eup %4074 }
 0x8b4   :  { %v1623_v29 = vadd.f32 1.0, %v4075_v27  ;;  %v4077_v48 = vpop.eup %4076 }
 0x8b5   :  { %v1629_v3 = vadd.f32 1.0, %v4077_v48  ;;  %v5452_v48 = vld [vmem:[#allocation25_spill] sm:$0xff] }
 0x8b6   :  { %4078 = vrcp.f32 %v1623_v29  ;;  %v5451_v29 = vld [vmem:[#allocation24_spill] sm:$0xff] }
 0x8b7   :  { %4080 = vrcp.f32 %v1629_v3  ;;  %v5454_v3 = vld [vmem:[#allocation27_spill] sm:$0xff] }
 0x8c0   :  { %v4079_v53 = vpop.eup %4078 }
 0x8c1   :  { %v1632_v23 = vmul.f32 %v4079_v53, %v1618_v35  ;;  %v4081_v44 = vpop.eup %4080  ;;  %v5455_v35 = vld [vmem:[#allocation28_spill] sm:$0xff]  ;;  %v5456_v53 = vld [vmem:[#allocation29_spill] sm:$0xff] }
 0x8c2   :  { %v1635_v50 = vsub.f32 1.0, %v4081_v44  ;;  %v1637_v37 = vmul.f32 %v4081_v44, %v4769_v41  ;;  %v5453_v41 = vld [vmem:[#allocation26_spill] sm:$0xff]  ;;  %v5459_v44 = vld [vmem:[#allocation43_spill] sm:$0xff] }
 0x8c3   :  { %v1633_v28 = vadd.f32 %v1632_v23, %v1616_v45  ;;  %v5450_v45 = vld [vmem:[#allocation23_spill] sm:$0xff] }
 0x8c4   :  { %v5457_v23 = vld [vmem:[#allocation39_spill] sm:$0xff] }
 0x8c5   :  { %4082 = vtanh.f32 %v1633_v28  ;;  %v5458_v28 = vld [vmem:[#allocation41_spill] sm:$0xff] }
 0x8cf   :  { %v4083_v57 = vpop.eup %4082 }
 0x8d0   :  { %v1636_v56 = vmul.f32 %v4083_v57, %v1635_v50  ;;  %v5460_v50 = vld [vmem:[#allocation45_spill] sm:$0xff]  ;;  %v5461_v57 = vld [vmem:[#allocation47_spill] sm:$0xff] }
 0x8d2   :  { %v4904_v11 = vadd.f32 %v1637_v37, %v1636_v56  ;;  %v5462_v37 = vld [vmem:[#allocation49_spill] sm:$0xff]  ;;  %v5463_v56 = vld [vmem:[#allocation51_spill] sm:$0xff] }
 0x8d4   :  { %v1642_v27 = vrot.slane %v4904_v11, %v5448_v42 }
 0x8d6   :  { %v1643_v21 = vmul.f32 %v4911_v9, %v1642_v27  ;;  %v5464_v27 = vld [vmem:[#allocation53_spill] sm:$0xff] }
 0x8d8   :  { %3221 = vmatmul.mubr.f32.vlgmr.msra.gmra.mrb[12].mxu0 %v1643_v21  ;;  %v5465_v21 = vld [vmem:[#allocation55_spill] sm:$0xff] }
 0x8d9   :  { %3790 = vmatpush1.bf16.msra.mxu0 %v5450_v45 }
 0x8da   :  { %3792 = vmatprep.subr.bf16.mxu0 %v5451_v29 }
 0x8dd   :  { %3794 = vmatpush1.bf16.msra.mxu0 %v5452_v48 }
 0x8de   :  { %3796 = vmatprep.subr.bf16.mxu0 %v5453_v41 }
 0x8e1   :  { %3798 = vmatpush1.bf16.msra.mxu0 %v5454_v3 }
 0x8e2   :  { %3800 = vmatprep.subr.bf16.mxu0 %v5455_v35  ;;  %v5466_v35 = vld [vmem:[#allocation57_spill] sm:$0xff] }
 0x8e5   :  { %3802 = vmatpush1.bf16.msra.mxu0 %v5456_v53  ;;  %v5467_v53 = vld [vmem:[#allocation9_spill] sm:$0xff] }
 0x8e6   :  { %3804 = vmatprep.subr.bf16.mxu0 %v5457_v23 }
 0x8e9   :  { %3806 = vmatpush1.bf16.msra.mxu0 %v5458_v28 }
 0x8ea   :  { %3808 = vmatprep.subr.bf16.mxu0 %v5459_v44  ;;  %v5468_v44 = vld [vmem:[#allocation21_spill] sm:$0xff] }
 0x8ed   :  { %3810 = vmatpush1.bf16.msra.mxu0 %v5460_v50  ;;  %v5478_v50 = vld [vmem:[#allocation40_spill] sm:$0xff] }
 0x8ee   :  { %3812 = vmatprep.subr.bf16.mxu0 %v5461_v57  ;;  %v5474_v57 = vld [vmem:[#allocation35_spill] sm:$0xff] }
 0x8f1   :  { %3814 = vmatpush1.bf16.msra.mxu0 %v5462_v37  ;;  %v2936_v37 = vld [vmem:[%s5192_s0 + $0x20] sm:$0xff] }
 0x8f2   :  { %3816 = vmatprep.subr.bf16.mxu0 %v5463_v56 }
 0x8f5   :  { %3818 = vmatpush1.bf16.msra.mxu0 %v5464_v27 }
 0x8f6   :  { %3820 = vmatprep.subr.bf16.mxu0 %v5465_v21 }
 0x8f9   :  { %3822 = vmatpush1.bf16.msra.mxu0 %v5466_v35  ;;  %v5472_v35 = vld [vmem:[#allocation33_spill] sm:$0xff] }
 0x8fa   :  { %3856 = vmatprep.subr.bf16.mxu0 %v5467_v53  ;;  %v2937_v53 = vld [vmem:[%s5192_s0 + $0x28] sm:$0xff] }
 0x9ab   :  { %v1710_v23 = vpop.f32.mrb[12].mxu0 }
 0x9ac   :  { %v3222_v28 = vpop.f32.mrb[13].mxu0  ;;  %3223 = vmatprep.subr.mxu1 %v1710_v23 }
 0x9ad   :  { %3224 = vmatpush3.msra.mxu1 %v1710_v23  ;;  %v5469_v28 = vld [vmem:[#allocation30_spill] sm:$0xff]  ;;  %v5470_v23 = vld [vmem:[#allocation31_spill] sm:$0xff] }
 0x9ae   :  { %3226 = vmatmul.mubr.msk.f32.vlgmr.msra.gmra.mrb[20].mxu1 %vm75_vm0, %v5468_v44  ;;  %v5471_v44 = vld [vmem:[#allocation32_spill] sm:$0xff] }
 0x9af   :  { %3232 = vmatprep.mubr.msk.f32.mxu1 %vm514_vm2, %v2936_v37  ;;  %v5473_v37 = vld [vmem:[#allocation34_spill] sm:$0xff] }
 0xa81   :  { %v3227_v27 = vpop.f32.mrb[20].mxu1 }
 0xa82   :  { %v1786_v56 = vpop.f32.mrb[21].mxu1 }
 0xa83   :  { %v3747_v21 = vpack.c.bf16 %v3227_v27, %v1786_v56  ;;  %v5475_v56 = vld [vmem:[#allocation36_spill] sm:$0xff]  ;;  %v5476_v27 = vld [vmem:[#allocation37_spill] sm:$0xff] }
 0xa85   :  { %3748 = vmatprep.subr.bf16.mxu1 %v3747_v21 }
 0xa86   :  { %3750 = vmatpush3.bf16.msra.mxu1 %v3747_v21  ;;  %v5477_v21 = vld [vmem:[#allocation38_spill] sm:$0xff] }
 0xa87   :  { %3752 = vmatprep.subr.bf16.mxu1 %v5469_v28  ;;  %v5479_v28 = vld [vmem:[#allocation42_spill] sm:$0xff] }
 0xa89   :  { %3233 = vmatmul.mubr.msk.f32.vlgmr.msra.gmra.mrb[22].mxu1 %vm514_vm2, %v2937_v53  ;;  %v5480_v53 = vld [vmem:[#allocation44_spill] sm:$0xff] }
 0xa8a   :  { %3754 = vmatpush1.bf16.msra.mxu1 %v5470_v23  ;;  %v5481_v23 = vld [vmem:[#allocation46_spill] sm:$0xff] }
 0xa8b   :  { %3756 = vmatprep.subr.bf16.mxu1 %v5471_v44  ;;  %v5482_v44 = vld [vmem:[#allocation48_spill] sm:$0xff] }
 0xa8e   :  { %3758 = vmatpush1.bf16.msra.mxu1 %v5472_v35  ;;  %v5483_v35 = vld [vmem:[#allocation50_spill] sm:$0xff] }
 0xa8f   :  { %3760 = vmatprep.subr.bf16.mxu1 %v5473_v37  ;;  %v5484_v37 = vld [vmem:[#allocation52_spill] sm:$0xff] }
 0xa92   :  { %3762 = vmatpush1.bf16.msra.mxu1 %v5474_v57  ;;  %v5485_v57 = vld [vmem:[#allocation54_spill] sm:$0xff] }
 0xa93   :  { %3764 = vmatprep.subr.bf16.mxu1 %v5475_v56  ;;  %v5486_v56 = vld [vmem:[#allocation56_spill] sm:$0xff] }
 0xa96   :  { %3766 = vmatpush1.bf16.msra.mxu1 %v5476_v27  ;;  %v5487_v27 = vld [vmem:[#allocation8_spill] sm:$0xff] }
 0xa97   :  { %3768 = vmatprep.subr.bf16.mxu1 %v5477_v21 }
 0xa9a   :  { %3770 = vmatpush1.bf16.msra.mxu1 %v5478_v50 }
 0xa9b   :  { %3772 = vmatprep.subr.bf16.mxu1 %v5479_v28  ;;  %v4964_v28 = vld [vmem:[%s5193_s1 + $0x30] sm:$0xff] }
 0xa9c   :  { %5488 = vst [vmem:[#allocation59_spill] sm:$0xff] %v4964_v28 }
 0xa9e   :  { %3774 = vmatpush1.bf16.msra.mxu1 %v5480_v53 }
 0xa9f   :  { %3776 = vmatprep.subr.bf16.mxu1 %v5481_v23  ;;  %v4969_v23 = vld [vmem:[%s5193_s1 + $0x38] sm:$0xff] }
 0xaa0   :  { %5489 = vst [vmem:[#allocation61_spill] sm:$0xff] %v4969_v23 }
 0xaa2   :  { %3778 = vmatpush1.bf16.msra.mxu1 %v5482_v44 }
 0xaa3   :  { %3780 = vmatprep.subr.bf16.mxu1 %v5483_v35  ;;  %v2058_v35 = vsel %vm75_vm0, %v4964_v28, 0.0 }
 0xaa6   :  { %3782 = vmatpush1.bf16.msra.mxu1 %v5484_v37 }
 0xaa7   :  { %3784 = vmatprep.subr.bf16.mxu1 %v5485_v57  ;;  %v2059_v57 = vsel %vm75_vm0, %v4969_v23, 0.0 }
 0xaa8   :  { %v2060_v37 = vadd.f32 %v2059_v57, %v2058_v35 }
 0xaaa   :  { %3786 = vmatpush1.bf16.msra.mxu1 %v5486_v56  ;;  %v2061_v56 = vrot.slane %v2060_v37, 4 }
 0xaab   :  { %3824 = vmatprep.subr.bf16.mxu1 %v5487_v27 }
 0xaac   :  { %v2062_v50 = vadd.f32 %v2061_v56, %v2060_v37 }
 0xaae   :  { %v2063_v29 = vrot.slane %v2062_v50, 2 }
 0xab0   :  { %v2064_v42 = vadd.f32 %v2063_v29, %v2062_v50 }
 0xab2   :  { %v2065_v54 = vrot.slane %v2064_v42, 1 }
 0xab4   :  { %v2066_v57 = vadd.f32 %v2065_v54, %v2064_v42 }
 0xb5c   :  { %v3234_v44 = vpop.f32.mrb[22].mxu1 }
 0xb5d   :  { %v1877_v27 = vmax.f32 %v3234_v44, 0.0  ;;  %v1867_v53 = vpop.f32.mrb[23].mxu1  ;;  %v2067_v44 = vmul.f32 0.0625, %v2066_v57 }
 0xb5e   :  { %v1876_v21 = vmax.f32 %v1867_v53, 0.0  ;;  %v5501_v53 = vld [vmem:[#allocation16_spill] sm:$0xff] }
 0xb5f   :  { %v1879_v3 = vsel %vm514_vm2, %v1877_v27, 0.0 }
 0xb60   :  { %v1878_v41 = vsel %vm514_vm2, %v1876_v21, 0.0 }
 0xb61   :  { %v1880_v48 = vadd.f32 %v1879_v3, %v1878_v41 }
 0xb63   :  { %v1881_v45 = vrot.slane %v1880_v48, 4 }
 0xb65   :  { %v1882_v9 = vadd.f32 %v1881_v45, %v1880_v48  ;;  %v5500_v48 = vld [vmem:[#allocation20_spill] sm:$0xff] }
 0xb67   :  { %v1883_v28 = vrot.slane %v1882_v9, 2 }
 0xb69   :  { %v1884_v16 = vadd.f32 %v1883_v28, %v1882_v9  ;;  %v5499_v9 = vld [vmem:[#allocation19_spill] sm:$0xff] }
 0xb6b   :  { %v1885_v23 = vrot.slane %v1884_v16, 1 }
 0xb6d   :  { %v1886_v35 = vadd.f32 %v1885_v23, %v1884_v16 }
 0xb6f   :  { %v1887_v18 = vmul.f32 0.0625, %v1886_v35  ;;  %v5502_v35 = vld [vmem:[#allocation58_spill] sm:$0xff] }
 0xb71   :  { %2948 = vmatprep.mubr.msk.f32.mxu1 %vm514_vm2, %v1887_v18  ;;  %2949 = vmatprep.mubr.msk.f32.mxu0 %vm514_vm2, %v1887_v18 }
 0xb72   :  { %1956 = vmatmul.mubr.f32.vlgmr.msra.gmra.mrb[24].mxu1 %v4899_v1  ;;  %2027 = vmatmul.mubr.f32.vlgmr.msra.gmra.mrb[14].mxu0 %v4899_v1 }
 0xb73   :  { %3826 = vmatpush1.bf16.msra.mxu1 %v4265_v7  ;;  %3858 = vmatpush1.bf16.msra.mxu0 %v4284_v30  ;;  %v5490_v7 = vld [vmem:[#allocation11_spill] sm:$0xff]  ;;  %v5494_v30 = vld [vmem:[#allocation10_spill] sm:$0xff] }
 0xb74   :  { %3828 = vmatprep.subr.bf16.mxu1 %v4267_v8  ;;  %3860 = vmatprep.subr.bf16.mxu0 %v4290_v36  ;;  %v5491_v8 = vld [vmem:[#allocation12_spill] sm:$0xff] }
 0xb75   :  { %2956 = vmatprep.mubr.msk.f32.mxu1 %vm75_vm0, %v2067_v44  ;;  %2957 = vmatprep.mubr.msk.f32.mxu0 %vm75_vm0, %v2067_v44  ;;  %v5503_v44 = vld [vmem:[#allocation59_spill] sm:$0xff] }
 0xb77   :  { %3830 = vmatpush1.bf16.msra.mxu1 %v4271_v13  ;;  %3862 = vmatpush1.bf16.msra.mxu0 %v4297_v43  ;;  %v5492_v13 = vld [vmem:[#allocation13_spill] sm:$0xff] }
 0xb78   :  { %3832 = vmatprep.subr.bf16.mxu1 %v4274_v14  ;;  %3864 = vmatprep.subr.bf16.mxu0 %v4304_v46  ;;  %v5493_v14 = vld [vmem:[#allocation14_spill] sm:$0xff]  ;;  %v5495_v46 = vld [vmem:[#allocation15_spill] sm:$0xff] }
 0xb7b   :  { %3834 = vmatpush1.bf16.msra.mxu1 %v4277_v19  ;;  %3866 = vmatpush1.bf16.msra.mxu0 %v4322_v60 }
 0xb7c   :  { %3836 = vmatprep.subr.bf16.mxu1 %v4280_v22  ;;  %3868 = vmatprep.subr.bf16.mxu0 %v4325_v62 }
 0xb7f   :  { %3838 = vmatpush1.bf16.msra.mxu1 %v4287_v33  ;;  %3870 = vmatpush1.bf16.msra.mxu0 %v4334_v15  ;;  %v5496_v15 = vld [vmem:[#allocation60_spill] sm:$0xff] }
 0xb80   :  { %3840 = vmatprep.subr.bf16.mxu1 %v4293_v38  ;;  %3872 = vmatprep.subr.bf16.mxu0 %v4337_v17 }
 0xb83   :  { %3842 = vmatpush1.bf16.msra.mxu1 %v4314_v51  ;;  %3874 = vmatpush1.bf16.msra.mxu0 %v4346_v32 }
 0xb84   :  { %3844 = vmatprep.subr.bf16.mxu1 %v4319_v55  ;;  %3876 = vmatprep.subr.bf16.mxu0 %v4349_v34 }
 0xb87   :  { %3846 = vmatpush1.bf16.msra.mxu1 %v4328_v5  ;;  %3878 = vmatpush1.bf16.msra.mxu0 %v4359_v49 }
 0xb88   :  { %3848 = vmatprep.subr.bf16.mxu1 %v4331_v6  ;;  %3880 = vmatprep.subr.bf16.mxu0 %v4361_v52  ;;  %v5497_v52 = vld [vmem:[#allocation17_spill] sm:$0xff] }
 0xb8b   :  { %3850 = vmatpush1.bf16.msra.mxu1 %v4340_v25  ;;  %3882 = vmatpush1.bf16.msra.mxu0 %v4374_v61 }
 0xb8c   :  { %3852 = vmatprep.subr.bf16.mxu1 %v4343_v26  ;;  %3884 = vmatprep.subr.bf16.mxu0 %v4378_v63 }
 0xb8f   :  { %3854 = vmatpush1.bf16.msra.mxu1 %v4352_v40  ;;  %3886 = vmatpush1.bf16.msra.mxu0 %v4383_v2 }
 0xb90   :  { %2103 = vmatprep.subr.mxu1 %v4857_v10  ;;  %2174 = vmatprep.subr.mxu0 %v4860_v59 }
 0xb93   :  { %2104 = vmatpush1.msra.mxu1 %v4863_v58  ;;  %2175 = vmatpush1.msra.mxu0 %v4866_v0 }
 0xb94   :  { %2136 = vmatmul.mubr.f32.vlgmr.msra.gmra.mrb[26].mxu1 %v4904_v11  ;;  %2207 = vmatmul.mubr.f32.vlgmr.msra.gmra.mrb[16].mxu0 %v4904_v11 }
 0xb95   :  { %3887 = vmatprep.subr.bf16.mxu1 %v5382_v31  ;;  %3267 = vmatprep.mubr.msk.f32.mxu1 %vm4172_vm1, %v5383_v39 }
 0xb96   :  { %3889 = vmatpush3.bf16.msra.mxu1 %v4402_v12 }
 0xb97   :  { %3890 = vmatprep.subr.bf16.mxu1 %v5382_v31 }
 0xb9a   :  { %3892 = vmatpush3.bf16.msra.mxu1 %v4413_v20  ;;  %v5498_v20 = vld [vmem:[#allocation18_spill] sm:$0xff] }
 0xb9b   :  { %3893 = vmatprep.subr.bf16.mxu1 %v5382_v31 }
 0xb9e   :  { %3895 = vmatpush3.bf16.msra.mxu1 %v4423_v24 }
 0xb9f   :  { %3896 = vmatprep.subr.bf16.mxu1 %v5382_v31 }
 0xba2   :  { %3898 = vmatpush3.bf16.msra.mxu1 %v5386_v4 }
 0xba3   :  { %3899 = vmatprep.subr.bf16.mxu1 %v5382_v31 }
 0xba6   :  { %3901 = vmatpush3.bf16.msra.mxu1 %v5490_v7 }
 0xba7   :  { %3902 = vmatprep.subr.bf16.mxu1 %v5382_v31 }
 0xbaa   :  { %3904 = vmatpush3.bf16.msra.mxu1 %v5491_v8 }
 0xbab   :  { %3905 = vmatprep.subr.bf16.mxu1 %v5382_v31 }
 0xbae   :  { %3907 = vmatpush3.bf16.msra.mxu1 %v5492_v13  ;;  %v5504_v13 = vld [vmem:[#allocation61_spill] sm:$0xff] }
 0xbaf   :  { %3908 = vmatprep.subr.bf16.mxu1 %v5382_v31 }
 0xbb2   :  { %3910 = vmatpush3.bf16.msra.mxu1 %v5493_v14  ;;  %v5505_v14 = vld [vmem:[#allocation22_spill] sm:$0xff] }
 0xc45   :  { %v1957_v19 = vpop.f32.mrb[24].mxu1  ;;  %v2028_v22 = vpop.f32.mrb[14].mxu0 }
 0xc46   :  { %v1958_v33 = vadd.f32 %v1957_v19, %v5494_v30  ;;  %v1959_v36 = vpop.f32.mrb[25].mxu1  ;;  %v2030_v38 = vpop.f32.mrb[15].mxu0  ;;  %v2029_v26 = vadd.f32 %v2028_v22, %v5443_v47  ;;  %v5506_v19 = vld [vmem:[#allocation23_spill] sm:$0xff]  ;;  %v5508_v22 = vld [vmem:[#allocation25_spill] sm:$0xff] }
 0xc47   :  { %v1960_v51 = vadd.f32 %v1959_v36, %v5495_v46  ;;  %v2031_v17 = vadd.f32 %v2030_v38, %v5496_v15  ;;  %v5510_v36 = vld [vmem:[#allocation27_spill] sm:$0xff]  ;;  %v5511_v38 = vld [vmem:[#allocation28_spill] sm:$0xff] }
 0xc48   :  { %v2950_v43 = vmul.f32 -1.442695, %v1958_v33  ;;  %v5509_v33 = vld [vmem:[#allocation26_spill] sm:$0xff] }
 0xc49   :  { %v2951_v55 = vmul.f32 -1.442695, %v1960_v51  ;;  %v5513_v51 = vld [vmem:[#allocation39_spill] sm:$0xff] }
 0xc4a   :  { %4084 = vpow2.f32 %v2950_v43  ;;  %v5512_v43 = vld [vmem:[#allocation29_spill] sm:$0xff] }
 0xc4b   :  { %4086 = vpow2.f32 %v2951_v55  ;;  %v5514_v55 = vld [vmem:[#allocation41_spill] sm:$0xff] }
 0xc54   :  { %v4085_v60 = vpop.eup %4084 }
 0xc55   :  { %v2036_v62 = vadd.f32 1.0, %v4085_v60  ;;  %v4087_v5 = vpop.eup %4086  ;;  %v5515_v60 = vld [vmem:[#allocation43_spill] sm:$0xff] }
 0xc56   :  { %v2042_v6 = vadd.f32 1.0, %v4087_v5  ;;  %v5517_v5 = vld [vmem:[#allocation47_spill] sm:$0xff] }
 0xc57   :  { %4088 = vrcp.f32 %v2036_v62  ;;  %v5516_v62 = vld [vmem:[#allocation45_spill] sm:$0xff] }
 0xc58   :  { %4090 = vrcp.f32 %v2042_v6  ;;  %v5518_v6 = vld [vmem:[#allocation49_spill] sm:$0xff] }
 0xc61   :  { %v4089_v25 = vpop.eup %4088 }
 0xc62   :  { %v2045_v32 = vmul.f32 %v4089_v25, %v2031_v17  ;;  %v4091_v31 = vpop.eup %4090  ;;  %v5519_v17 = vld [vmem:[#allocation51_spill] sm:$0xff]  ;;  %v5520_v25 = vld [vmem:[#allocation53_spill] sm:$0xff] }
 0xc63   :  { %v2048_v4 = vsub.f32 1.0, %v4091_v31  ;;  %v2050_v58 = vmul.f32 %v4091_v31, %v4899_v1  ;;  %v5528_v31 = vld [vmem:[#allocation35_spill] sm:$0xff] }
 0xc64   :  { %v2046_v34 = vadd.f32 %v2045_v32, %v2029_v26  ;;  %v5521_v26 = vld [vmem:[#allocation55_spill] sm:$0xff]  ;;  %v5522_v32 = vld [vmem:[#allocation57_spill] sm:$0xff] }
 0xc66   :  { %4092 = vtanh.f32 %v2046_v34  ;;  %v5076_v34 = vld [vmem:[%s5192_s0 + $0x30] sm:$0xff] }
 0xc67   :  { %v2137_v40 = vpop.f32.mrb[26].mxu1  ;;  %v2208_v49 = vpop.f32.mrb[16].mxu0  ;;  %3279 = vmatprep.mubr.msk.f32.mxu0 %vm514_vm2, %v5076_v34 }
 0xc68   :  { %v2138_v61 = vadd.f32 %v2137_v40, %v5497_v52  ;;  %v2139_v63 = vpop.f32.mrb[27].mxu1  ;;  %v2210_v2 = vpop.f32.mrb[17].mxu0  ;;  %v2209_v41 = vadd.f32 %v2208_v49, %v5500_v48 }
 0xc69   :  { %v2140_v24 = vadd.f32 %v2139_v63, %v5498_v20  ;;  %v2211_v45 = vadd.f32 %v2210_v2, %v5499_v9  ;;  %v5523_v63 = vld [vmem:[#allocation30_spill] sm:$0xff]  ;;  %v5524_v2 = vld [vmem:[#allocation31_spill] sm:$0xff]  ;;  %v5526_v20 = vld [vmem:[#allocation33_spill] sm:$0xff] }
 0xc6a   :  { %v2958_v12 = vmul.f32 -1.442695, %v2138_v61  ;;  %v5083_v61 = vld [vmem:[%s5192_s0 + $0x38] sm:$0xff]  ;;  %v5538_v9 = vld [vmem:[#allocation52_spill] sm:$0xff] }
 0xc6b   :  { %v2959_v39 = vmul.f32 -1.442695, %v2140_v24  ;;  %v5527_v24 = vld [vmem:[#allocation34_spill] sm:$0xff] }
 0xc6c   :  { %4094 = vpow2.f32 %v2958_v12  ;;  %v5525_v12 = vld [vmem:[#allocation32_spill] sm:$0xff] }
 0xc6d   :  { %4096 = vpow2.f32 %v2959_v39  ;;  %v5529_v39 = vld [vmem:[#allocation36_spill] sm:$0xff] }
 0xc70   :  { %v4093_v10 = vpop.eup %4092 }
 0xc71   :  { %v2049_v59 = vmul.f32 %v4093_v10, %v2048_v4  ;;  %v5530_v4 = vld [vmem:[#allocation37_spill] sm:$0xff]  ;;  %v5531_v10 = vld [vmem:[#allocation38_spill] sm:$0xff] }
 0xc73   :  { %v5044_v0 = vadd.f32 %v2050_v58, %v2049_v59  ;;  %v5532_v59 = vld [vmem:[#allocation40_spill] sm:$0xff]  ;;  %v5533_v58 = vld [vmem:[#allocation42_spill] sm:$0xff] }
 0xc76   :  { %v4095_v18 = vpop.eup %4094 }
 0xc77   :  { %v2216_v54 = vadd.f32 1.0, %v4095_v18  ;;  %v4097_v16 = vpop.eup %4096  ;;  %v5534_v18 = vld [vmem:[#allocation44_spill] sm:$0xff] }
 0xc78   :  { %v2222_v42 = vadd.f32 1.0, %v4097_v16  ;;  %v5536_v16 = vld [vmem:[#allocation48_spill] sm:$0xff] }
 0xc79   :  { %4098 = vrcp.f32 %v2216_v54  ;;  %v5535_v54 = vld [vmem:[#allocation46_spill] sm:$0xff] }
 0xc7a   :  { %4100 = vrcp.f32 %v2222_v42  ;;  %v5537_v42 = vld [vmem:[#allocation50_spill] sm:$0xff] }
 0xc83   :  { %v4099_v29 = vpop.eup %4098 }
 0xc84   :  { %v2225_v3 = vmul.f32 %v4099_v29, %v2211_v45  ;;  %v4101_v28 = vpop.eup %4100  ;;  %v5539_v45 = vld [vmem:[#allocation54_spill] sm:$0xff]  ;;  %v5540_v29 = vld [vmem:[#allocation56_spill] sm:$0xff] }
 0xc85   :  { %v2228_v23 = vsub.f32 1.0, %v4101_v28  ;;  %v2230_v56 = vmul.f32 %v4101_v28, %v4904_v11  ;;  %v5507_v11 = vld [vmem:[#allocation24_spill] sm:$0xff] }
 0xc86   :  { %v2226_v50 = vadd.f32 %v2225_v3, %v2209_v41 }
 0xc88   :  { %4102 = vtanh.f32 %v2226_v50 }
 0xc92   :  { %v4103_v1 = vpop.eup %4102 }
 0xc93   :  { %v2229_v37 = vmul.f32 %v4103_v1, %v2228_v23 }
 0xc95   :  { %v2231_v21 = vadd.f32 %v2230_v56, %v2229_v37 }
 0xc97   :  { %v2235_v27 = vrot.slane %v2231_v21, %v5501_v53 }
 0xc99   :  { %v2236_v57 = vmul.f32 %v5502_v35, %v2235_v27 }
 0xc9b   :  { %3268 = vmatmul.mubr.f32.vlgmr.msra.gmra.mrb[28].mxu1 %v2236_v57 }
 0xc9c   :  { %3272 = vmatprep.mubr.msk.f32.mxu1 %vm75_vm0, %v5503_v44 }
 0xd6e   :  { %v2303_v7 = vpop.f32.mrb[28].mxu1 }
 0xd6f   :  { %v3269_v8 = vpop.f32.mrb[29].mxu1  ;;  %3270 = vmatprep.subr.mxu1 %v2303_v7 }
 0xd70   :  { %3271 = vmatpush3.msra.mxu1 %v2303_v7  ;;  %v2653_v7 = vld [vmem:[%s5203_s11] sm:$0xff]  ;;  %v2654_v8 = vld [vmem:[%s5203_s11 + $0x8] sm:$0xff] }
 0xd71   :  { %3273 = vmatmul.mubr.msk.f32.vlgmr.msra.gmra.mrb[30].mxu1 %vm75_vm0, %v5504_v13  ;;  %3952 = vmatprep.subr.bf16.mxu1 %v5505_v14  ;;  %v3987_v13 = vpack.c.bf16 %v2654_v8, %v2653_v7  ;;  %v2655_v14 = vld [vmem:[%s5203_s11 + $0x10] sm:$0xff] }
 0xd72   :  { %3954 = vmatpush1.bf16.msra.mxu1 %v5506_v19  ;;  %v2656_v19 = vld [vmem:[%s5203_s11 + $0x18] sm:$0xff] }
 0xd73   :  { %3956 = vmatprep.subr.bf16.mxu1 %v5507_v11  ;;  %v3991_v11 = vpack.c.bf16 %v2656_v19, %v2655_v14 }
 0xd76   :  { %3958 = vmatpush1.bf16.msra.mxu1 %v5508_v22  ;;  %v2657_v22 = vld [vmem:[%s5203_s11 + $0x20] sm:$0xff] }
 0xd77   :  { %3960 = vmatprep.subr.bf16.mxu1 %v5509_v33  ;;  %v2658_v33 = vld [vmem:[%s5203_s11 + $0x28] sm:$0xff] }
 0xd7a   :  { %3962 = vmatpush1.bf16.msra.mxu1 %v5510_v36  ;;  %v3995_v36 = vpack.c.bf16 %v2658_v33, %v2657_v22 }
 0xd7b   :  { %3964 = vmatprep.subr.bf16.mxu1 %v5511_v38  ;;  %v2659_v38 = vld [vmem:[%s5203_s11 + $0x30] sm:$0xff] }
 0xd7e   :  { %3966 = vmatpush1.bf16.msra.mxu1 %v5512_v43  ;;  %v2660_v43 = vld [vmem:[%s5203_s11 + $0x38] sm:$0xff] }
 0xd7f   :  { %3968 = vmatprep.subr.bf16.mxu1 %v5513_v51  ;;  %v3999_v51 = vpack.c.bf16 %v2660_v43, %v2659_v38 }
 0xd82   :  { %3970 = vmatpush1.bf16.msra.mxu1 %v5514_v55  ;;  %v2661_v55 = vld [vmem:[%s5203_s11 + $0x40] sm:$0xff] }
 0xd83   :  { %3972 = vmatprep.subr.bf16.mxu1 %v5515_v60  ;;  %v2662_v60 = vld [vmem:[%s5203_s11 + $0x48] sm:$0xff] }
 0xd86   :  { %3974 = vmatpush1.bf16.msra.mxu1 %v5516_v62  ;;  %v2663_v62 = vld [vmem:[%s5203_s11 + $0x50] sm:$0xff] }
 0xd87   :  { %3976 = vmatprep.subr.bf16.mxu1 %v5517_v5  ;;  %v4003_v5 = vpack.c.bf16 %v2662_v60, %v2661_v55 }
 0xd8a   :  { %3978 = vmatpush1.bf16.msra.mxu1 %v5518_v6  ;;  %v2664_v6 = vld [vmem:[%s5203_s11 + $0x58] sm:$0xff] }
 0xd8b   :  { %3980 = vmatprep.subr.bf16.mxu1 %v5519_v17  ;;  %v4007_v17 = vpack.c.bf16 %v2664_v6, %v2663_v62 }
 0xd8e   :  { %3982 = vmatpush1.bf16.msra.mxu1 %v5520_v25  ;;  %v2665_v25 = vld [vmem:[%s5203_s11 + $0x60] sm:$0xff] }
 0xd8f   :  { %3984 = vmatprep.subr.bf16.mxu1 %v5521_v26  ;;  %v2666_v26 = vld [vmem:[%s5203_s11 + $0x68] sm:$0xff] }
 0xd92   :  { %3986 = vmatpush1.bf16.msra.mxu1 %v5522_v32  ;;  %v4011_v32 = vpack.c.bf16 %v2666_v26, %v2665_v25 }
 0xe44   :  { %v3274_v40 = vpop.f32.mrb[30].mxu1 }
 0xe45   :  { %v2379_v49 = vpop.f32.mrb[31].mxu1 }
 0xe46   :  { %v3911_v52 = vpack.c.bf16 %v3274_v40, %v2379_v49  ;;  %v2667_v40 = vld [vmem:[%s5203_s11 + $0x70] sm:$0xff]  ;;  %v2668_v49 = vld [vmem:[%s5203_s11 + $0x78] sm:$0xff] }
 0xe48   :  { %3912 = vmatprep.subr.bf16.mxu0 %v3911_v52 }
 0xe49   :  { %3914 = vmatpush3.bf16.msra.mxu0 %v3911_v52  ;;  %v4015_v52 = vpack.c.bf16 %v2668_v49, %v2667_v40 }
 0xe4a   :  { %3916 = vmatprep.subr.bf16.mxu0 %v5523_v63 }
 0xe4c   :  { %3280 = vmatmul.mubr.msk.f32.vlgmr.msra.gmra.mrb[18].mxu0 %vm514_vm2, %v5083_v61 }
 0xe4d   :  { %3918 = vmatpush1.bf16.msra.mxu0 %v5524_v2 }
 0xe4e   :  { %3920 = vmatprep.subr.bf16.mxu0 %v5525_v12 }
 0xe51   :  { %3922 = vmatpush1.bf16.msra.mxu0 %v5526_v20 }
 0xe52   :  { %3924 = vmatprep.subr.bf16.mxu0 %v5527_v24 }
 0xe55   :  { %3926 = vmatpush1.bf16.msra.mxu0 %v5528_v31 }
 0xe56   :  { %3928 = vmatprep.subr.bf16.mxu0 %v5529_v39 }
 0xe59   :  { %3930 = vmatpush1.bf16.msra.mxu0 %v5530_v4 }
 0xe5a   :  { %3932 = vmatprep.subr.bf16.mxu0 %v5531_v10 }
 0xe5d   :  { %3934 = vmatpush1.bf16.msra.mxu0 %v5532_v59 }
 0xe5e   :  { %3936 = vmatprep.subr.bf16.mxu0 %v5533_v58 }
 0xe61   :  { %3938 = vmatpush1.bf16.msra.mxu0 %v5534_v18 }
 0xe62   :  { %3940 = vmatprep.subr.bf16.mxu0 %v5535_v54 }
 0xe65   :  { %3942 = vmatpush1.bf16.msra.mxu0 %v5536_v16 }
 0xe66   :  { %3944 = vmatprep.subr.bf16.mxu0 %v5537_v42 }
 0xe69   :  { %3946 = vmatpush1.bf16.msra.mxu0 %v5538_v9 }
 0xe6a   :  { %3948 = vmatprep.subr.bf16.mxu0 %v5539_v45 }
 0xe6d   :  { %3950 = vmatpush1.bf16.msra.mxu0 %v5540_v29 }
 0xe6e   :  { %3988 = vmatprep.subr.bf16.mxu0 %v3987_v13 }
 0xf1f   :  { %v5105_v48 = vpop.f32.mrb[18].mxu0 }
 0xf20   :  { %v2470_v41 = vmax.f32 %v5105_v48, 0.0  ;;  %v2460_v3 = vpop.f32.mrb[19].mxu0 }
 0xf21   :  { %v2469_v50 = vmax.f32 %v2460_v3, 0.0 }
 0xf22   :  { %v2472_v28 = vsel %vm514_vm2, %v2470_v41, 0.0 }
 0xf23   :  { %v2471_v23 = vsel %vm514_vm2, %v2469_v50, 0.0 }
 0xf24   :  { %v2473_v1 = vadd.f32 %v2472_v28, %v2471_v23  ;;  %v2645_v23 = vld [vmem:[%s5202_s10] sm:$0xff] }
 0xf26   :  { %v2474_v37 = vrot.slane %v2473_v1, 4 }
 0xf28   :  { %v2475_v56 = vadd.f32 %v2474_v37, %v2473_v1 }
 0xf2a   :  { %v2476_v21 = vrot.slane %v2475_v56, 2 }
 0xf2c   :  { %v2477_v27 = vadd.f32 %v2476_v21, %v2475_v56 }
 0xf2e   :  { %v2478_v35 = vrot.slane %v2477_v27, 1 }
 0xf30   :  { %v2479_v57 = vadd.f32 %v2478_v35, %v2477_v27 }
 0xf32   :  { %v2480_v44 = vmul.f32 0.0625, %v2479_v57 }
 0xf34   :  { %2964 = vmatprep.mubr.msk.f32.mxu0 %vm514_vm2, %v2480_v44  ;;  %2965 = vmatprep.mubr.msk.f32.mxu1 %vm514_vm2, %v2480_v44 }
 0xf35   :  { %2549 = vmatmul.mubr.f32.vlgmr.msra.gmra.mrb[20].mxu0 %v5044_v0  ;;  %2620 = vmatmul.mubr.f32.vlgmr.msra.gmra.mrb[32].mxu1 %v5044_v0 }
 0xf36   :  { %3321 = vmatprep.mubr.msk.f32.mxu1 %vm514_vm2, %v2469_v50  ;;  %3990 = vmatpush3.bf16.msra.mxu0 %v3987_v13 }
 0xf37   :  { %3992 = vmatprep.subr.bf16.mxu0 %v3991_v11 }
 0xf3a   :  { %3994 = vmatpush3.bf16.msra.mxu0 %v3991_v11 }
 0xf3b   :  { %3996 = vmatprep.subr.bf16.mxu0 %v3995_v36 }
 0xf3e   :  { %3998 = vmatpush3.bf16.msra.mxu0 %v3995_v36 }
 0xf3f   :  { %4000 = vmatprep.subr.bf16.mxu0 %v3999_v51 }
 0xf42   :  { %4002 = vmatpush3.bf16.msra.mxu0 %v3999_v51 }
 0xf43   :  { %4004 = vmatprep.subr.bf16.mxu0 %v4003_v5 }
 0xf46   :  { %4006 = vmatpush3.bf16.msra.mxu0 %v4003_v5 }
 0xf47   :  { %4008 = vmatprep.subr.bf16.mxu0 %v4007_v17 }
 0xf4a   :  { %4010 = vmatpush3.bf16.msra.mxu0 %v4007_v17 }
 0xf4b   :  { %4012 = vmatprep.subr.bf16.mxu0 %v4011_v32 }
 0xf4e   :  { %4014 = vmatpush3.bf16.msra.mxu0 %v4011_v32 }
 0xf4f   :  { %4016 = vmatprep.subr.bf16.mxu0 %v4015_v52 }
 0xf52   :  { %4018 = vmatpush3.bf16.msra.mxu0 %v4015_v52 }
0x1008   :  { %v2550_v63 = vpop.f32.mrb[20].mxu0  ;;  %v2621_v2 = vpop.f32.mrb[32].mxu1 }
0x1009   :  { %v2551_v12 = vadd.f32 %v2550_v63, %v5494_v30  ;;  %v2552_v20 = vpop.f32.mrb[21].mxu0  ;;  %v2623_v24 = vpop.f32.mrb[33].mxu1  ;;  %v2622_v42 = vadd.f32 %v2621_v2, %v5443_v47 }
0x100a   :  { %v2553_v39 = vadd.f32 %v2552_v20, %v5495_v46  ;;  %v2624_v54 = vadd.f32 %v2623_v24, %v5496_v15  ;;  %v2646_v15 = vld [vmem:[%s5202_s10 + $0x8] sm:$0xff] }
0x100b   :  { %v2966_v31 = vmul.f32 -1.442695, %v2551_v12 }
0x100c   :  { %v2967_v4 = vmul.f32 -1.442695, %v2553_v39 }
0x100d   :  { %4104 = vpow2.f32 %v2966_v31 }
0x100e   :  { %4106 = vpow2.f32 %v2967_v4 }
0x1017   :  { %v4105_v10 = vpop.eup %4104 }
0x1018   :  { %v2629_v59 = vadd.f32 1.0, %v4105_v10  ;;  %v4107_v58 = vpop.eup %4106 }
0x1019   :  { %v2635_v18 = vadd.f32 1.0, %v4107_v58 }
0x101a   :  { %4108 = vrcp.f32 %v2629_v59 }
0x101b   :  { %4110 = vrcp.f32 %v2635_v18 }
0x1024   :  { %v4109_v16 = vpop.eup %4108 }
0x1025   :  { %v2638_v30 = vmul.f32 %v4109_v16, %v2624_v54  ;;  %v4111_v45 = vpop.eup %4110 }
0x1026   :  { %v2641_v29 = vsub.f32 1.0, %v4111_v45  ;;  %v2643_v50 = vmul.f32 %v4111_v45, %v5044_v0 }
0x1027   :  { %v2639_v9 = vadd.f32 %v2638_v30, %v2622_v42 }
0x1029   :  { %4112 = vtanh.f32 %v2639_v9 }
0x1033   :  { %v4113_v46 = vpop.eup %4112 }
0x1034   :  { %v2642_v3 = vmul.f32 %v4113_v46, %v2641_v29 }
0x1036   :  { %v2644_v28 = vadd.f32 %v2643_v50, %v2642_v3 }
0x1038   :  { %v2650_v47 = vrot.slane %v2644_v28, %v5501_v53 }
0x103a   :  { %v2651_v1 = vmul.f32 %v2650_v47, %v2645_v23  ;;  %v2652_v37 = vmul.f32 %v2650_v47, %v2646_v15 }
0x103c   :  { %3314 = vmatprep.mubr.f32.mxu0 %v2651_v1 }
0x103d   :  { %3315 = vmatmul.mubr.f32.vlgmr.msra.gmra.mrb[22].mxu0 %v2652_v37 }
0x1110   :  { %v3316_v56 = vpop.f32.mrb[22].mxu0 }
0x1111   :  { %v2735_v21 = vpop.f32.mrb[23].mxu0 }
0x1112   :  { %v4019_v27 = vpack.c.bf16 %v3316_v56, %v2735_v21 }
0x1114   :  { %4020 = vmatprep.subr.bf16.mxu1 %v4019_v27 }
0x1115   :  { %4022 = vmatpush3.bf16.msra.mxu1 %v4019_v27 }
0x1118   :  { %3322 = vmatmul.mubr.msk.f32.vlgmr.msra.gmra.mrb[34].mxu1 %vm514_vm2, %v2470_v41 }
0x1119   :  { %3328 = vmatprep.mubr.msk.f32.mxu1 %vm514_vm2, %v5076_v34 }
0x11eb   :  { %v3323_v0 = vpop.f32.mrb[34].mxu1 }
0x11ec   :  { %v2816_v35 = vpop.f32.mrb[35].mxu1 }
0x11ed   :  { %v4023_v57 = vpack.c.bf16 %v3323_v0, %v2816_v35 }
0x11ef   :  { %4024 = vmatprep.subr.bf16.mxu1 %v4023_v57 }
0x11f0   :  { %4026 = vmatpush3.bf16.msra.mxu1 %v4023_v57 }
0x11f3   :  { %3329 = vmatmul.mubr.msk.f32.vlgmr.msra.gmra.mrb[36].mxu1 %vm514_vm2, %v5083_v61 }
0x12c6   :  { %v3330_v53 = vpop.f32.mrb[36].mxu1 }
0x12c7   :  { %2901 = vst.msk [vmem:[%s5204_s12 + $0x8] sm:$0xff] %vm75_vm0, %v3330_v53  ;;  %v2891_v48 = vpop.f32.mrb[37].mxu1 }
0x12c8   :  { %2900 = vst.msk [vmem:[%s5204_s12] sm:$0xff] %vm75_vm0, %v2891_v48 }
0x12c9   :  { %2906 = vsyncpa [#allocation3], 1 }
0x12ca   :  { %2907 = vsyncpa [#allocation5], 1 }

</bundles_post_ra>
